<compile_context>
chip_gen: v7x
topology: tpu7x:2x2x1
jax: 0.10.0
libtpu: 0.0.40
codegen_flags: <defaults>
</compile_context>

<pallas_src>
import functools
import math

import jax
import jax.numpy as jnp
from jax.experimental import pallas as pl
from jax.experimental.pallas import tpu as pltpu

# ---- small synthetic BERT config (shapes only; no checkpoint load) ----
VOCAB = 64
HIDDEN = 128
N_LAYERS = 2
N_HEADS = 2
HEAD_DIM = HIDDEN // N_HEADS
INTERMEDIATE = 256
MAX_POS = 16
TYPE_VOCAB = 2
LN_EPS = 1e-12
N_CLASSES = 3
CLS_PAD = 128  # lane-dense padded classifier output width


# ---------------- in-kernel helpers (traced inside the Pallas body) ----------------

def _layer_norm(x, g, b):
    # f32 statistics on purpose (v5e has no bf16 VPU/EUP path).
    mean = jnp.mean(x, axis=-1, keepdims=True)
    d = x - mean
    var = jnp.mean(d * d, axis=-1, keepdims=True)
    return d * jax.lax.rsqrt(var + LN_EPS) * g + b


def _gelu_tanh(x):
    c = math.sqrt(2.0 / math.pi)
    return 0.5 * x * (1.0 + jnp.tanh(c * (x + 0.044715 * x * x * x)))


# ---------------- the fused kernel (whole model, grid over encoder layers) ----------------

def _fused_bert_kernel(emb_ref, bias_ref, eg_ref, eb_ref,
                       wqkv_ref, bqkv_ref, wo_ref, bo_ref,
                       ln1g_ref, ln1b_ref, w1_ref, b1_ref, w2_ref, b2_ref,
                       ln2g_ref, ln2b_ref,
                       pw_ref, pb_ref, cw_ref, cb_ref,
                       o_ref, h_scratch,
                       *, batch, seq, n_heads, head_dim):
    layer = pl.program_id(0)
    hidden = n_heads * head_dim

    # ---- grid step 0: embeddings LayerNorm (folded former _emb_ln_kernel) ----
    @pl.when(layer == 0)
    def _():
        h_scratch[...] = _layer_norm(emb_ref[...], eg_ref[...], eb_ref[...])

    h = h_scratch[...]                                               # (B*S, H) f32, carried in VMEM

    # ---- fused QKV projection: one MXU matmul, bf16 operands, f32 accumulate ----
    # (1/sqrt(head_dim) is pre-folded into the Q columns of wqkv/bqkv.)
    qkv = jnp.dot(h.astype(jnp.bfloat16), wqkv_ref[...],
                  preferred_element_type=jnp.float32) + bqkv_ref[...]
    # Cast ONCE to bf16 before per-head lane slices (halves vregs touched by 64-lane offsets).
    qkv3 = qkv.astype(jnp.bfloat16).reshape(batch, seq, 3 * hidden)  # (B, S, 3H) bf16

    # Precomputed additive mask (B, S) -> (B, 1, S); built once outside the kernel.
    bias = bias_ref[...][:, None, :]

    # ---- per-head attention + per-head accumulated output projection (no lane concat) ----
    attn = bo_ref[...]                                               # (1, H) f32 accumulator seed
    for hh in range(n_heads):                                        # static unroll
        q = qkv3[:, :, hh * head_dim:(hh + 1) * head_dim]
        k = qkv3[:, :, hidden + hh * head_dim:hidden + (hh + 1) * head_dim]
        v = qkv3[:, :, 2 * hidden + hh * head_dim:2 * hidden + (hh + 1) * head_dim]
        s = jnp.einsum("bqd,bkd->bqk", q, k,
                       preferred_element_type=jnp.float32) + bias    # (B, S, S) f32
        m = jnp.max(s, axis=-1, keepdims=True)
        p = jnp.exp(s - m)
        l = jnp.sum(p, axis=-1, keepdims=True)
        o = jnp.einsum("bqk,bkd->bqd", p.astype(jnp.bfloat16), v,
                       preferred_element_type=jnp.float32)
        ctx = (o * pl.reciprocal(l, approx=True)).reshape(batch * seq, head_dim)
        # wo row-slice is a free sublane slice; per-head accumulation stays lane-aligned.
        attn = attn + jnp.dot(ctx.astype(jnp.bfloat16),
                              wo_ref[hh * head_dim:(hh + 1) * head_dim, :],
                              preferred_element_type=jnp.float32)

    # ---- attention residual + LN1 ----
    h1 = _layer_norm(attn + h, ln1g_ref[...], ln1b_ref[...])

    # ---- FFN (w1 + GELU + w2) + residual + LN2 ----
    ffn = jnp.dot(h1.astype(jnp.bfloat16), w1_ref[...],
                  preferred_element_type=jnp.float32) + b1_ref[...]
    ffn = _gelu_tanh(ffn)
    ffn_out = jnp.dot(ffn.astype(jnp.bfloat16), w2_ref[...],
                      preferred_element_type=jnp.float32) + b2_ref[...]
    h2 = _layer_norm(ffn_out + h1, ln2g_ref[...], ln2b_ref[...])
    h_scratch[...] = h2                                              # carry to next layer

    # ---- last grid step: pooler(tanh) + dropout(identity at inference) + classifier ----
    @pl.when(layer == pl.num_programs(0) - 1)
    def _():
        # CLS rows = row 0 of each sequence: single aligned sublane select, no concat.
        cls = h2.reshape(batch, seq, hidden)[:, 0, :]                # (B, H)
        pooled = jnp.tanh(jnp.dot(cls.astype(jnp.bfloat16), pw_ref[...],
                                  preferred_element_type=jnp.float32) + pb_ref[...])
        logits = jnp.dot(pooled.astype(jnp.bfloat16), cw_ref[...],
                         preferred_element_type=jnp.float32) + cb_ref[...]
        o_ref[...] = logits.astype(o_ref.dtype)                      # (B, 128) lane-dense


# ---------------- pallas_call wrapper (ONE call for the whole model) ----------------

def fused_bert(emb, bias, kp, *, batch, seq):
    kernel = functools.partial(_fused_bert_kernel, batch=batch, seq=seq,
                               n_heads=N_HEADS, head_dim=HEAD_DIM)

    def full2d(a):
        # Untiled 2-D array, VMEM-resident across all layer steps (block index constant).
        return pl.BlockSpec(a.shape, lambda l: (0, 0))

    def per_layer(a):
        # Stacked (L, d0, d1): one layer's slab per grid step, leading axis squeezed.
        return pl.BlockSpec((None,) + tuple(a.shape[1:]), lambda l: (l, 0, 0))

    in_arrays = [emb, bias, kp["emb_ln_g"], kp["emb_ln_b"],
                 kp["wqkv"], kp["bqkv"], kp["wo"], kp["bo"],
                 kp["ln1_g"], kp["ln1_b"], kp["w1"], kp["b1"], kp["w2"], kp["b2"],
                 kp["ln2_g"], kp["ln2_b"],
                 kp["pool_w"], kp["pool_b"], kp["cls_w"], kp["cls_b"]]
    in_specs = [full2d(emb), full2d(bias), full2d(kp["emb_ln_g"]), full2d(kp["emb_ln_b"]),
                per_layer(kp["wqkv"]), per_layer(kp["bqkv"]),
                per_layer(kp["wo"]), per_layer(kp["bo"]),
                per_layer(kp["ln1_g"]), per_layer(kp["ln1_b"]),
                per_layer(kp["w1"]), per_layer(kp["b1"]),
                per_layer(kp["w2"]), per_layer(kp["b2"]),
                per_layer(kp["ln2_g"]), per_layer(kp["ln2_b"]),
                full2d(kp["pool_w"]), full2d(kp["pool_b"]),
                full2d(kp["cls_w"]), full2d(kp["cls_b"])]

    return pl.pallas_call(
        kernel,
        out_shape=jax.ShapeDtypeStruct((batch, CLS_PAD), jnp.float32),
        grid_spec=pltpu.PrefetchScalarGridSpec(
            num_scalar_prefetch=0,
            grid=(N_LAYERS,),
            in_specs=in_specs,
            out_specs=pl.BlockSpec((batch, CLS_PAD), lambda l: (0, 0)),
            scratch_shapes=[pltpu.VMEM((batch * seq, HIDDEN), jnp.float32)]),
        compiler_params=pltpu.CompilerParams(
            dimension_semantics=("arbitrary",),
            vmem_limit_bytes=32 * 1024 * 1024),
    )(*in_arrays)


# ---------------- parameters (deterministic synthetic init + one-time kernel packing) ----------------

def init_params(key):
    def nrm(k, shape, scale=0.02):
        return scale * jax.random.normal(k, shape, dtype=jnp.float32)

    keys = iter(jax.random.split(key, 128))
    p = {
        "word_emb": nrm(next(keys), (VOCAB, HIDDEN)),
        "pos_emb": nrm(next(keys), (MAX_POS, HIDDEN)),
        "type_emb": nrm(next(keys), (TYPE_VOCAB, HIDDEN)),
        "emb_ln_g": jnp.ones((HIDDEN,), jnp.float32),
        "emb_ln_b": jnp.zeros((HIDDEN,), jnp.float32),
        "layers": [],
        "pool_w": nrm(next(keys), (HIDDEN, HIDDEN)),
        "pool_b": jnp.zeros((HIDDEN,), jnp.float32),
        "cls_w": nrm(next(keys), (HIDDEN, N_CLASSES)),
        "cls_b": jnp.zeros((N_CLASSES,), jnp.float32),
    }
    for _ in range(N_LAYERS):
        p["layers"].append({
            "wq": nrm(next(keys), (HIDDEN, HIDDEN)), "bq": jnp.zeros((HIDDEN,), jnp.float32),
            "wk": nrm(next(keys), (HIDDEN, HIDDEN)), "bk": jnp.zeros((HIDDEN,), jnp.float32),
            "wv": nrm(next(keys), (HIDDEN, HIDDEN)), "bv": jnp.zeros((HIDDEN,), jnp.float32),
            "wo": nrm(next(keys), (HIDDEN, HIDDEN)), "bo": jnp.zeros((HIDDEN,), jnp.float32),
            "ln1_g": jnp.ones((HIDDEN,), jnp.float32), "ln1_b": jnp.zeros((HIDDEN,), jnp.float32),
            "w1": nrm(next(keys), (HIDDEN, INTERMEDIATE)), "b1": jnp.zeros((INTERMEDIATE,), jnp.float32),
            "w2": nrm(next(keys), (INTERMEDIATE, HIDDEN)), "b2": jnp.zeros((HIDDEN,), jnp.float32),
            "ln2_g": jnp.ones((HIDDEN,), jnp.float32), "ln2_b": jnp.zeros((HIDDEN,), jnp.float32),
        })
    return p


def prepare_params(p):
    """One-time packing: layer-stacked fused-QKV weights (attention scale folded into Q),
    bf16 MXU weights, 2-D row biases, padded lane-dense classifier."""
    def row(v):
        return v.reshape(1, -1).astype(jnp.float32)

    scale = 1.0 / math.sqrt(HEAD_DIM)
    stacks = {k: [] for k in ["wqkv", "bqkv", "wo", "bo", "ln1_g", "ln1_b",
                              "w1", "b1", "w2", "b2", "ln2_g", "ln2_b"]}
    for L in p["layers"]:
        stacks["wqkv"].append(jnp.concatenate(
            [L["wq"] * scale, L["wk"], L["wv"]], axis=1).astype(jnp.bfloat16))
        stacks["bqkv"].append(row(jnp.concatenate([L["bq"] * scale, L["bk"], L["bv"]])))
        stacks["wo"].append(L["wo"].astype(jnp.bfloat16)); stacks["bo"].append(row(L["bo"]))
        stacks["ln1_g"].append(row(L["ln1_g"])); stacks["ln1_b"].append(row(L["ln1_b"]))
        stacks["w1"].append(L["w1"].astype(jnp.bfloat16)); stacks["b1"].append(row(L["b1"]))
        stacks["w2"].append(L["w2"].astype(jnp.bfloat16)); stacks["b2"].append(row(L["b2"]))
        stacks["ln2_g"].append(row(L["ln2_g"])); stacks["ln2_b"].append(row(L["ln2_b"]))

    cls_w = jnp.zeros((HIDDEN, CLS_PAD), jnp.float32).at[:, :N_CLASSES].set(p["cls_w"])
    cls_b = jnp.zeros((CLS_PAD,), jnp.float32).at[:N_CLASSES].set(p["cls_b"])

    kp = {
        "word_emb": p["word_emb"], "pos_emb": p["pos_emb"], "type_emb": p["type_emb"],
        "emb_ln_g": row(p["emb_ln_g"]), "emb_ln_b": row(p["emb_ln_b"]),
        "pool_w": p["pool_w"].astype(jnp.bfloat16), "pool_b": row(p["pool_b"]),
        "cls_w": cls_w.astype(jnp.bfloat16), "cls_b": row(cls_b),
    }
    for k, v in stacks.items():
        kp[k] = jnp.stack(v, axis=0)
    return kp


# ---------------- forward pass (== SequenceClassifier.forward, eval mode) ----------------

def sequence_classifier_forward(kparams, input_ids, token_type_ids, attention_mask):
    B, S = input_ids.shape

    # BERT embeddings (gathers are XLA glue); LayerNorm happens inside the fused kernel (step 0).
    emb = (jnp.take(kparams["word_emb"], input_ids, axis=0)
           + jnp.take(kparams["type_emb"], token_type_ids, axis=0)
           + kparams["pos_emb"][None, :S, :])
    emb = emb.reshape(B * S, HIDDEN).astype(jnp.float32)

    # Additive attention mask built ONCE (not per layer): (B, S) f32.
    bias = (1.0 - attention_mask.astype(jnp.float32)) * -10000.0

    # Entire encoder + pooler + dropout(identity) + classifier: one fused pallas_call.
    logits_pad = fused_bert(emb, bias, kparams, batch=B, seq=S)
    return logits_pad[:, :N_CLASSES]


if __name__ == "__main__":
    key = jax.random.PRNGKey(0)
    k_param, k_ids, k_types = jax.random.split(key, 3)

    B, S = 2, 8
    params = init_params(k_param)
    kparams = prepare_params(params)

    input_ids = jax.random.randint(k_ids, (B, S), 0, VOCAB, dtype=jnp.int32)
    token_type_ids = jax.random.randint(k_types, (B, S), 0, TYPE_VOCAB, dtype=jnp.int32)
    # second sequence has two padding positions at the end
    attention_mask = jnp.array([[1] * S, [1] * (S - 2) + [0, 0]], dtype=jnp.int32)

    fwd = jax.jit(sequence_classifier_forward)
    logits = fwd(kparams, input_ids, token_type_ids, attention_mask)
    jax.block_until_ready(logits)
    assert logits.shape == (B, N_CLASSES) and logits.dtype == jnp.float32
    assert bool(jnp.all(jnp.isfinite(logits)))
    print("KERNEL_OK")
</pallas_src>

<mosaic_0001>
module attributes {stable_mosaic.version = 11 : i64} {
  func.func @_fused_bert_kernel(%arg0: i32, %arg1: memref<16x128xf32, #tpu.memory_space<vmem>>, %arg2: memref<2x8xf32, #tpu.memory_space<vmem>>, %arg3: memref<1x128xf32, #tpu.memory_space<vmem>>, %arg4: memref<1x128xf32, #tpu.memory_space<vmem>>, %arg5: memref<1x128x384xbf16, #tpu.memory_space<vmem>>, %arg6: memref<1x1x384xf32, #tpu.memory_space<vmem>>, %arg7: memref<1x128x128xbf16, #tpu.memory_space<vmem>>, %arg8: memref<1x1x128xf32, #tpu.memory_space<vmem>>, %arg9: memref<1x1x128xf32, #tpu.memory_space<vmem>>, %arg10: memref<1x1x128xf32, #tpu.memory_space<vmem>>, %arg11: memref<1x128x256xbf16, #tpu.memory_space<vmem>>, %arg12: memref<1x1x256xf32, #tpu.memory_space<vmem>>, %arg13: memref<1x256x128xbf16, #tpu.memory_space<vmem>>, %arg14: memref<1x1x128xf32, #tpu.memory_space<vmem>>, %arg15: memref<1x1x128xf32, #tpu.memory_space<vmem>>, %arg16: memref<1x1x128xf32, #tpu.memory_space<vmem>>, %arg17: memref<128x128xbf16, #tpu.memory_space<vmem>>, %arg18: memref<1x128xf32, #tpu.memory_space<vmem>>, %arg19: memref<128x128xbf16, #tpu.memory_space<vmem>>, %arg20: memref<1x128xf32, #tpu.memory_space<vmem>>, %arg21: memref<2x128xf32, #tpu.memory_space<vmem>>, %arg22: memref<16x128xf32, #tpu.memory_space<vmem>>) attributes {dimension_semantics = [#tpu.dimension_semantics<arbitrary>], iteration_bounds = array<i64: 2>, scalar_prefetch = 0 : i64, scratch_operands = 1 : i64, tpu.core_type = #tpu.core_type<tc>, window_params = [{pipeline_mode = #tpu.pipeline_mode<synchronous>, transform_indices = @transform_0, window_bounds = array<i64: 16, 128>}, {pipeline_mode = #tpu.pipeline_mode<synchronous>, transform_indices = @transform_1, window_bounds = array<i64: 2, 8>}, {pipeline_mode = #tpu.pipeline_mode<synchronous>, transform_indices = @transform_2, window_bounds = array<i64: 1, 128>}, {pipeline_mode = #tpu.pipeline_mode<synchronous>, transform_indices = @transform_3, window_bounds = array<i64: 1, 128>}, {transform_indices = @transform_4, window_bounds = array<i64: 1, 128, 384>}, {transform_indices = @transform_5, window_bounds = array<i64: 1, 1, 384>}, {transform_indices = @transform_6, window_bounds = array<i64: 1, 128, 128>}, {transform_indices = @transform_7, window_bounds = array<i64: 1, 1, 128>}, {transform_indices = @transform_8, window_bounds = array<i64: 1, 1, 128>}, {transform_indices = @transform_9, window_bounds = array<i64: 1, 1, 128>}, {transform_indices = @transform_10, window_bounds = array<i64: 1, 128, 256>}, {transform_indices = @transform_11, window_bounds = array<i64: 1, 1, 256>}, {transform_indices = @transform_12, window_bounds = array<i64: 1, 256, 128>}, {transform_indices = @transform_13, window_bounds = array<i64: 1, 1, 128>}, {transform_indices = @transform_14, window_bounds = array<i64: 1, 1, 128>}, {transform_indices = @transform_15, window_bounds = array<i64: 1, 1, 128>}, {pipeline_mode = #tpu.pipeline_mode<synchronous>, transform_indices = @transform_16, window_bounds = array<i64: 128, 128>}, {pipeline_mode = #tpu.pipeline_mode<synchronous>, transform_indices = @transform_17, window_bounds = array<i64: 1, 128>}, {pipeline_mode = #tpu.pipeline_mode<synchronous>, transform_indices = @transform_18, window_bounds = array<i64: 128, 128>}, {pipeline_mode = #tpu.pipeline_mode<synchronous>, transform_indices = @transform_19, window_bounds = array<i64: 1, 128>}, {pipeline_mode = #tpu.pipeline_mode<synchronous>, transform_indices = @transform_20, window_bounds = array<i64: 2, 128>}]} {
    %c0_i32 = arith.constant 0 : i32
    %0 = arith.cmpi eq, %arg0, %c0_i32 : i32
    %1 = arith.extui %0 : i1 to i32
    %c0_i32_0 = arith.constant 0 : i32
    %2 = arith.cmpi ne, %1, %c0_i32_0 : i32
    scf.if %2 {
      %c0_71 = arith.constant 0 : index
      %c0_72 = arith.constant 0 : index
      %150 = vector.load %arg1[%c0_71, %c0_72] : memref<16x128xf32, #tpu.memory_space<vmem>>, vector<16x128xf32>
      %c0_73 = arith.constant 0 : index
      %c0_74 = arith.constant 0 : index
      %151 = vector.load %arg3[%c0_73, %c0_74] : memref<1x128xf32, #tpu.memory_space<vmem>>, vector<1x128xf32>
      %c0_75 = arith.constant 0 : index
      %c0_76 = arith.constant 0 : index
      %152 = vector.load %arg4[%c0_75, %c0_76] : memref<1x128xf32, #tpu.memory_space<vmem>>, vector<1x128xf32>
      %cst_77 = arith.constant dense<0.000000e+00> : vector<16xf32>
      %153 = vector.multi_reduction <add>, %150, %cst_77 [1] : vector<16x128xf32> to vector<16xf32>
      %154 = vector.shape_cast %153 : vector<16xf32> to vector<16x1xf32>
      %cst_78 = arith.constant 1.280000e+02 : f32
      %155 = vector.broadcast %cst_78 : f32 to vector<16x1xf32>
      %156 = arith.divf %154, %155 : vector<16x1xf32>
      %157 = vector.broadcast %156 : vector<16x1xf32> to vector<16x128xf32>
      %158 = arith.subf %150, %157 : vector<16x128xf32>
      %159 = arith.mulf %158, %158 : vector<16x128xf32>
      %cst_79 = arith.constant dense<0.000000e+00> : vector<16xf32>
      %160 = vector.multi_reduction <add>, %159, %cst_79 [1] : vector<16x128xf32> to vector<16xf32>
      %161 = vector.shape_cast %160 : vector<16xf32> to vector<16x1xf32>
      %cst_80 = arith.constant 1.280000e+02 : f32
      %162 = vector.broadcast %cst_80 : f32 to vector<16x1xf32>
      %163 = arith.divf %161, %162 : vector<16x1xf32>
      %cst_81 = arith.constant 9.99999996E-13 : f32
      %164 = vector.broadcast %cst_81 : f32 to vector<16x1xf32>
      %165 = arith.addf %163, %164 : vector<16x1xf32>
      %166 = math.rsqrt %165 : vector<16x1xf32>
      %167 = vector.broadcast %166 : vector<16x1xf32> to vector<16x128xf32>
      %168 = arith.mulf %158, %167 : vector<16x128xf32>
      %169 = vector.broadcast %151 : vector<1x128xf32> to vector<16x128xf32>
      %170 = arith.mulf %168, %169 : vector<16x128xf32>
      %171 = vector.broadcast %152 : vector<1x128xf32> to vector<16x128xf32>
      %172 = arith.addf %170, %171 : vector<16x128xf32>
      %c0_82 = arith.constant 0 : index
      %c0_83 = arith.constant 0 : index
      %173 = vector.load %arg22[%c0_82, %c0_83] : memref<16x128xf32, #tpu.memory_space<vmem>>, vector<16x128xf32>
      tpu.vector_store %arg22[%c0_82, %c0_83], %172 {strides = array<i32>} : memref<16x128xf32, #tpu.memory_space<vmem>>, vector<16x128xf32>,
    } else {
    }
    %c0 = arith.constant 0 : index
    %c0_1 = arith.constant 0 : index
    %3 = vector.load %arg22[%c0, %c0_1] : memref<16x128xf32, #tpu.memory_space<vmem>>, vector<16x128xf32>
    %4 = arith.truncf %3 : vector<16x128xf32> to vector<16x128xbf16>
    %c0_2 = arith.constant 0 : index
    %c0_3 = arith.constant 0 : index
    %c0_4 = arith.constant 0 : index
    %5 = vector.load %arg5[%c0_2, %c0_3, %c0_4] : memref<1x128x384xbf16, #tpu.memory_space<vmem>>, vector<1x128x384xbf16>
    %6 = vector.shape_cast %5 : vector<1x128x384xbf16> to vector<128x384xbf16>
    %cst = arith.constant dense<0.000000e+00> : vector<16x384xf32>
    %7 = tpu.matmul %4, %6, %cst {dimension_numbers = #tpu.dot_dimension_numbers<[1], [0], [0], [1], [0, 0, 1, 1], [], []>} : vector<16x128xbf16>, vector<128x384xbf16>, vector<16x384xf32> -> vector<16x384xf32>
    %c0_5 = arith.constant 0 : index
    %c0_6 = arith.constant 0 : index
    %c0_7 = arith.constant 0 : index
    %8 = vector.load %arg6[%c0_5, %c0_6, %c0_7] : memref<1x1x384xf32, #tpu.memory_space<vmem>>, vector<1x1x384xf32>
    %9 = vector.shape_cast %8 : vector<1x1x384xf32> to vector<1x384xf32>
    %10 = vector.broadcast %9 : vector<1x384xf32> to vector<16x384xf32>
    %11 = arith.addf %7, %10 : vector<16x384xf32>
    %12 = arith.truncf %11 : vector<16x384xf32> to vector<16x384xbf16>
    %13 = vector.shape_cast %12 : vector<16x384xbf16> to vector<2x8x384xbf16>
    %c0_8 = arith.constant 0 : index
    %c0_9 = arith.constant 0 : index
    %14 = vector.load %arg2[%c0_8, %c0_9] : memref<2x8xf32, #tpu.memory_space<vmem>>, vector<2x8xf32>
    %15 = vector.shape_cast %14 : vector<2x8xf32> to vector<2x1x8xf32>
    %c0_10 = arith.constant 0 : index
    %c0_11 = arith.constant 0 : index
    %c0_12 = arith.constant 0 : index
    %16 = vector.load %arg8[%c0_10, %c0_11, %c0_12] : memref<1x1x128xf32, #tpu.memory_space<vmem>>, vector<1x1x128xf32>
    %17 = vector.shape_cast %16 : vector<1x1x128xf32> to vector<1x128xf32>
    %18 = vector.extract_strided_slice %13 {offsets = [0, 0, 0], sizes = [2, 8, 64], strides = [1, 1, 1]} : vector<2x8x384xbf16> to vector<2x8x64xbf16>
    %19 = vector.extract_strided_slice %13 {offsets = [0, 0, 128], sizes = [2, 8, 64], strides = [1, 1, 1]} : vector<2x8x384xbf16> to vector<2x8x64xbf16>
    %20 = vector.extract_strided_slice %13 {offsets = [0, 0, 256], sizes = [2, 8, 64], strides = [1, 1, 1]} : vector<2x8x384xbf16> to vector<2x8x64xbf16>
    "tpu.trace_start"() <{level = 10 : i32, message = "bqd,bkd->bqk"}> : () -> ()
    %cst_13 = arith.constant dense<0.000000e+00> : vector<2x8x8xf32>
    %21 = tpu.matmul %18, %19, %cst_13 {dimension_numbers = #tpu.dot_dimension_numbers<[2], [2], [1], [1], [0, 0, 0, 1, 1, 1], [0], [0]>} : vector<2x8x64xbf16>, vector<2x8x64xbf16>, vector<2x8x8xf32> -> vector<2x8x8xf32>
    "tpu.trace_stop"() : () -> ()
    %22 = vector.broadcast %15 : vector<2x1x8xf32> to vector<2x8x8xf32>
    %23 = arith.addf %21, %22 : vector<2x8x8xf32>
    %cst_14 = arith.constant dense<0xFF800000> : vector<2x8xf32>
    %24 = vector.multi_reduction <maximumf>, %23, %cst_14 [2] : vector<2x8x8xf32> to vector<2x8xf32>
    %25 = vector.shape_cast %24 : vector<2x8xf32> to vector<2x8x1xf32>
    %26 = vector.broadcast %25 : vector<2x8x1xf32> to vector<2x8x8xf32>
    %27 = arith.subf %23, %26 : vector<2x8x8xf32>
    %28 = math.exp %27 : vector<2x8x8xf32>
    %cst_15 = arith.constant dense<0.000000e+00> : vector<2x8xf32>
    %29 = vector.multi_reduction <add>, %28, %cst_15 [2] : vector<2x8x8xf32> to vector<2x8xf32>
    %30 = vector.shape_cast %29 : vector<2x8xf32> to vector<2x8x1xf32>
    %31 = arith.truncf %28 : vector<2x8x8xf32> to vector<2x8x8xbf16>
    "tpu.trace_start"() <{level = 10 : i32, message = "bqk,bkd->bqd"}> : () -> ()
    %cst_16 = arith.constant dense<0.000000e+00> : vector<2x8x64xf32>
    %32 = tpu.matmul %31, %20, %cst_16 {dimension_numbers = #tpu.dot_dimension_numbers<[2], [1], [1], [2], [0, 0, 0, 1, 1, 2], [0], [0]>} : vector<2x8x8xbf16>, vector<2x8x64xbf16>, vector<2x8x64xf32> -> vector<2x8x64xf32>
    "tpu.trace_stop"() : () -> ()
    %33 = tpu.reciprocal %30 {approx = true} : vector<2x8x1xf32> -> vector<2x8x1xf32>
    %34 = vector.broadcast %33 : vector<2x8x1xf32> to vector<2x8x64xf32>
    %35 = arith.mulf %32, %34 : vector<2x8x64xf32>
    %36 = vector.shape_cast %35 : vector<2x8x64xf32> to vector<16x64xf32>
    %37 = arith.truncf %36 : vector<16x64xf32> to vector<16x64xbf16>
    %c0_17 = arith.constant 0 : index
    %c0_18 = arith.constant 0 : index
    %c0_19 = arith.constant 0 : index
    %38 = vector.load %arg7[%c0_17, %c0_18, %c0_19] : memref<1x128x128xbf16, #tpu.memory_space<vmem>>, vector<1x64x128xbf16>
    %39 = vector.shape_cast %38 : vector<1x64x128xbf16> to vector<64x128xbf16>
    %cst_20 = arith.constant dense<0.000000e+00> : vector<16x128xf32>
    %40 = tpu.matmul %37, %39, %cst_20 {dimension_numbers = #tpu.dot_dimension_numbers<[1], [0], [0], [1], [0, 0, 1, 1], [], []>} : vector<16x64xbf16>, vector<64x128xbf16>, vector<16x128xf32> -> vector<16x128xf32>
    %41 = vector.broadcast %17 : vector<1x128xf32> to vector<16x128xf32>
    %42 = arith.addf %41, %40 : vector<16x128xf32>
    %43 = vector.extract_strided_slice %13 {offsets = [0, 0, 64], sizes = [2, 8, 64], strides = [1, 1, 1]} : vector<2x8x384xbf16> to vector<2x8x64xbf16>
    %44 = vector.extract_strided_slice %13 {offsets = [0, 0, 192], sizes = [2, 8, 64], strides = [1, 1, 1]} : vector<2x8x384xbf16> to vector<2x8x64xbf16>
    %45 = vector.extract_strided_slice %13 {offsets = [0, 0, 320], sizes = [2, 8, 64], strides = [1, 1, 1]} : vector<2x8x384xbf16> to vector<2x8x64xbf16>
    "tpu.trace_start"() <{level = 10 : i32, message = "bqd,bkd->bqk"}> : () -> ()
    %cst_21 = arith.constant dense<0.000000e+00> : vector<2x8x8xf32>
    %46 = tpu.matmul %43, %44, %cst_21 {dimension_numbers = #tpu.dot_dimension_numbers<[2], [2], [1], [1], [0, 0, 0, 1, 1, 1], [0], [0]>} : vector<2x8x64xbf16>, vector<2x8x64xbf16>, vector<2x8x8xf32> -> vector<2x8x8xf32>
    "tpu.trace_stop"() : () -> ()
    %47 = vector.broadcast %15 : vector<2x1x8xf32> to vector<2x8x8xf32>
    %48 = arith.addf %46, %47 : vector<2x8x8xf32>
    %cst_22 = arith.constant dense<0xFF800000> : vector<2x8xf32>
    %49 = vector.multi_reduction <maximumf>, %48, %cst_22 [2] : vector<2x8x8xf32> to vector<2x8xf32>
    %50 = vector.shape_cast %49 : vector<2x8xf32> to vector<2x8x1xf32>
    %51 = vector.broadcast %50 : vector<2x8x1xf32> to vector<2x8x8xf32>
    %52 = arith.subf %48, %51 : vector<2x8x8xf32>
    %53 = math.exp %52 : vector<2x8x8xf32>
    %cst_23 = arith.constant dense<0.000000e+00> : vector<2x8xf32>
    %54 = vector.multi_reduction <add>, %53, %cst_23 [2] : vector<2x8x8xf32> to vector<2x8xf32>
    %55 = vector.shape_cast %54 : vector<2x8xf32> to vector<2x8x1xf32>
    %56 = arith.truncf %53 : vector<2x8x8xf32> to vector<2x8x8xbf16>
    "tpu.trace_start"() <{level = 10 : i32, message = "bqk,bkd->bqd"}> : () -> ()
    %cst_24 = arith.constant dense<0.000000e+00> : vector<2x8x64xf32>
    %57 = tpu.matmul %56, %45, %cst_24 {dimension_numbers = #tpu.dot_dimension_numbers<[2], [1], [1], [2], [0, 0, 0, 1, 1, 2], [0], [0]>} : vector<2x8x8xbf16>, vector<2x8x64xbf16>, vector<2x8x64xf32> -> vector<2x8x64xf32>
    "tpu.trace_stop"() : () -> ()
    %58 = tpu.reciprocal %55 {approx = true} : vector<2x8x1xf32> -> vector<2x8x1xf32>
    %59 = vector.broadcast %58 : vector<2x8x1xf32> to vector<2x8x64xf32>
    %60 = arith.mulf %57, %59 : vector<2x8x64xf32>
    %61 = vector.shape_cast %60 : vector<2x8x64xf32> to vector<16x64xf32>
    %62 = arith.truncf %61 : vector<16x64xf32> to vector<16x64xbf16>
    %c0_25 = arith.constant 0 : index
    %c64 = arith.constant 64 : index
    %c0_26 = arith.constant 0 : index
    %63 = vector.load %arg7[%c0_25, %c64, %c0_26] : memref<1x128x128xbf16, #tpu.memory_space<vmem>>, vector<1x64x128xbf16>
    %64 = vector.shape_cast %63 : vector<1x64x128xbf16> to vector<64x128xbf16>
    %cst_27 = arith.constant dense<0.000000e+00> : vector<16x128xf32>
    %65 = tpu.matmul %62, %64, %cst_27 {dimension_numbers = #tpu.dot_dimension_numbers<[1], [0], [0], [1], [0, 0, 1, 1], [], []>} : vector<16x64xbf16>, vector<64x128xbf16>, vector<16x128xf32> -> vector<16x128xf32>
    %66 = arith.addf %42, %65 : vector<16x128xf32>
    %67 = arith.addf %66, %3 : vector<16x128xf32>
    %c0_28 = arith.constant 0 : index
    %c0_29 = arith.constant 0 : index
    %c0_30 = arith.constant 0 : index
    %68 = vector.load %arg9[%c0_28, %c0_29, %c0_30] : memref<1x1x128xf32, #tpu.memory_space<vmem>>, vector<1x1x128xf32>
    %69 = vector.shape_cast %68 : vector<1x1x128xf32> to vector<1x128xf32>
    %c0_31 = arith.constant 0 : index
    %c0_32 = arith.constant 0 : index
    %c0_33 = arith.constant 0 : index
    %70 = vector.load %arg10[%c0_31, %c0_32, %c0_33] : memref<1x1x128xf32, #tpu.memory_space<vmem>>, vector<1x1x128xf32>
    %71 = vector.shape_cast %70 : vector<1x1x128xf32> to vector<1x128xf32>
    %cst_34 = arith.constant dense<0.000000e+00> : vector<16xf32>
    %72 = vector.multi_reduction <add>, %67, %cst_34 [1] : vector<16x128xf32> to vector<16xf32>
    %73 = vector.shape_cast %72 : vector<16xf32> to vector<16x1xf32>
    %cst_35 = arith.constant 1.280000e+02 : f32
    %74 = vector.broadcast %cst_35 : f32 to vector<16x1xf32>
    %75 = arith.divf %73, %74 : vector<16x1xf32>
    %76 = vector.broadcast %75 : vector<16x1xf32> to vector<16x128xf32>
    %77 = arith.subf %67, %76 : vector<16x128xf32>
    %78 = arith.mulf %77, %77 : vector<16x128xf32>
    %cst_36 = arith.constant dense<0.000000e+00> : vector<16xf32>
    %79 = vector.multi_reduction <add>, %78, %cst_36 [1] : vector<16x128xf32> to vector<16xf32>
    %80 = vector.shape_cast %79 : vector<16xf32> to vector<16x1xf32>
    %cst_37 = arith.constant 1.280000e+02 : f32
    %81 = vector.broadcast %cst_37 : f32 to vector<16x1xf32>
    %82 = arith.divf %80, %81 : vector<16x1xf32>
    %cst_38 = arith.constant 9.99999996E-13 : f32
    %83 = vector.broadcast %cst_38 : f32 to vector<16x1xf32>
    %84 = arith.addf %82, %83 : vector<16x1xf32>
    %85 = math.rsqrt %84 : vector<16x1xf32>
    %86 = vector.broadcast %85 : vector<16x1xf32> to vector<16x128xf32>
    %87 = arith.mulf %77, %86 : vector<16x128xf32>
    %88 = vector.broadcast %69 : vector<1x128xf32> to vector<16x128xf32>
    %89 = arith.mulf %87, %88 : vector<16x128xf32>
    %90 = vector.broadcast %71 : vector<1x128xf32> to vector<16x128xf32>
    %91 = arith.addf %89, %90 : vector<16x128xf32>
    %92 = arith.truncf %91 : vector<16x128xf32> to vector<16x128xbf16>
    %c0_39 = arith.constant 0 : index
    %c0_40 = arith.constant 0 : index
    %c0_41 = arith.constant 0 : index
    %93 = vector.load %arg11[%c0_39, %c0_40, %c0_41] : memref<1x128x256xbf16, #tpu.memory_space<vmem>>, vector<1x128x256xbf16>
    %94 = vector.shape_cast %93 : vector<1x128x256xbf16> to vector<128x256xbf16>
    %cst_42 = arith.constant dense<0.000000e+00> : vector<16x256xf32>
    %95 = tpu.matmul %92, %94, %cst_42 {dimension_numbers = #tpu.dot_dimension_numbers<[1], [0], [0], [1], [0, 0, 1, 1], [], []>} : vector<16x128xbf16>, vector<128x256xbf16>, vector<16x256xf32> -> vector<16x256xf32>
    %c0_43 = arith.constant 0 : index
    %c0_44 = arith.constant 0 : index
    %c0_45 = arith.constant 0 : index
    %96 = vector.load %arg12[%c0_43, %c0_44, %c0_45] : memref<1x1x256xf32, #tpu.memory_space<vmem>>, vector<1x1x256xf32>
    %97 = vector.shape_cast %96 : vector<1x1x256xf32> to vector<1x256xf32>
    %98 = vector.broadcast %97 : vector<1x256xf32> to vector<16x256xf32>
    %99 = arith.addf %95, %98 : vector<16x256xf32>
    %cst_46 = arith.constant 5.000000e-01 : f32
    %100 = vector.broadcast %cst_46 : f32 to vector<16x256xf32>
    %101 = arith.mulf %100, %99 : vector<16x256xf32>
    %cst_47 = arith.constant 4.471500e-02 : f32
    %102 = vector.broadcast %cst_47 : f32 to vector<16x256xf32>
    %103 = arith.mulf %102, %99 : vector<16x256xf32>
    %104 = arith.mulf %103, %99 : vector<16x256xf32>
    %105 = arith.mulf %104, %99 : vector<16x256xf32>
    %106 = arith.addf %99, %105 : vector<16x256xf32>
    %cst_48 = arith.constant 0.797884583 : f32
    %107 = vector.broadcast %cst_48 : f32 to vector<16x256xf32>
    %108 = arith.mulf %107, %106 : vector<16x256xf32>
    %109 = math.tanh %108 : vector<16x256xf32>
    %cst_49 = arith.constant 1.000000e+00 : f32
    %110 = vector.broadcast %cst_49 : f32 to vector<16x256xf32>
    %111 = arith.addf %110, %109 : vector<16x256xf32>
    %112 = arith.mulf %101, %111 : vector<16x256xf32>
    %113 = arith.truncf %112 : vector<16x256xf32> to vector<16x256xbf16>
    %c0_50 = arith.constant 0 : index
    %c0_51 = arith.constant 0 : index
    %c0_52 = arith.constant 0 : index
    %114 = vector.load %arg13[%c0_50, %c0_51, %c0_52] : memref<1x256x128xbf16, #tpu.memory_space<vmem>>, vector<1x256x128xbf16>
    %115 = vector.shape_cast %114 : vector<1x256x128xbf16> to vector<256x128xbf16>
    %cst_53 = arith.constant dense<0.000000e+00> : vector<16x128xf32>
    %116 = tpu.matmul %113, %115, %cst_53 {dimension_numbers = #tpu.dot_dimension_numbers<[1], [0], [0], [1], [0, 0, 1, 1], [], []>} : vector<16x256xbf16>, vector<256x128xbf16>, vector<16x128xf32> -> vector<16x128xf32>
    %c0_54 = arith.constant 0 : index
    %c0_55 = arith.constant 0 : index
    %c0_56 = arith.constant 0 : index
    %117 = vector.load %arg14[%c0_54, %c0_55, %c0_56] : memref<1x1x128xf32, #tpu.memory_space<vmem>>, vector<1x1x128xf32>
    %118 = vector.shape_cast %117 : vector<1x1x128xf32> to vector<1x128xf32>
    %119 = vector.broadcast %118 : vector<1x128xf32> to vector<16x128xf32>
    %120 = arith.addf %116, %119 : vector<16x128xf32>
    %121 = arith.addf %120, %91 : vector<16x128xf32>
    %c0_57 = arith.constant 0 : index
    %c0_58 = arith.constant 0 : index
    %c0_59 = arith.constant 0 : index
    %122 = vector.load %arg15[%c0_57, %c0_58, %c0_59] : memref<1x1x128xf32, #tpu.memory_space<vmem>>, vector<1x1x128xf32>
    %123 = vector.shape_cast %122 : vector<1x1x128xf32> to vector<1x128xf32>
    %c0_60 = arith.constant 0 : index
    %c0_61 = arith.constant 0 : index
    %c0_62 = arith.constant 0 : index
    %124 = vector.load %arg16[%c0_60, %c0_61, %c0_62] : memref<1x1x128xf32, #tpu.memory_space<vmem>>, vector<1x1x128xf32>
    %125 = vector.shape_cast %124 : vector<1x1x128xf32> to vector<1x128xf32>
    %cst_63 = arith.constant dense<0.000000e+00> : vector<16xf32>
    %126 = vector.multi_reduction <add>, %121, %cst_63 [1] : vector<16x128xf32> to vector<16xf32>
    %127 = vector.shape_cast %126 : vector<16xf32> to vector<16x1xf32>
    %cst_64 = arith.constant 1.280000e+02 : f32
    %128 = vector.broadcast %cst_64 : f32 to vector<16x1xf32>
    %129 = arith.divf %127, %128 : vector<16x1xf32>
    %130 = vector.broadcast %129 : vector<16x1xf32> to vector<16x128xf32>
    %131 = arith.subf %121, %130 : vector<16x128xf32>
    %132 = arith.mulf %131, %131 : vector<16x128xf32>
    %cst_65 = arith.constant dense<0.000000e+00> : vector<16xf32>
    %133 = vector.multi_reduction <add>, %132, %cst_65 [1] : vector<16x128xf32> to vector<16xf32>
    %134 = vector.shape_cast %133 : vector<16xf32> to vector<16x1xf32>
    %cst_66 = arith.constant 1.280000e+02 : f32
    %135 = vector.broadcast %cst_66 : f32 to vector<16x1xf32>
    %136 = arith.divf %134, %135 : vector<16x1xf32>
    %cst_67 = arith.constant 9.99999996E-13 : f32
    %137 = vector.broadcast %cst_67 : f32 to vector<16x1xf32>
    %138 = arith.addf %136, %137 : vector<16x1xf32>
    %139 = math.rsqrt %138 : vector<16x1xf32>
    %140 = vector.broadcast %139 : vector<16x1xf32> to vector<16x128xf32>
    %141 = arith.mulf %131, %140 : vector<16x128xf32>
    %142 = vector.broadcast %123 : vector<1x128xf32> to vector<16x128xf32>
    %143 = arith.mulf %141, %142 : vector<16x128xf32>
    %144 = vector.broadcast %125 : vector<1x128xf32> to vector<16x128xf32>
    %145 = arith.addf %143, %144 : vector<16x128xf32>
    %c0_68 = arith.constant 0 : index
    %c0_69 = arith.constant 0 : index
    %146 = vector.load %arg22[%c0_68, %c0_69] : memref<16x128xf32, #tpu.memory_space<vmem>>, vector<16x128xf32>
    tpu.vector_store %arg22[%c0_68, %c0_69], %145 {strides = array<i32>} : memref<16x128xf32, #tpu.memory_space<vmem>>, vector<16x128xf32>,
    %c1_i32 = arith.constant 1 : i32
    %147 = arith.cmpi eq, %arg0, %c1_i32 : i32
    %148 = arith.extui %147 : i1 to i32
    %c0_i32_70 = arith.constant 0 : i32
    %149 = arith.cmpi ne, %148, %c0_i32_70 : i32
    scf.if %149 {
      %150 = vector.shape_cast %145 : vector<16x128xf32> to vector<2x8x128xf32>
      %151 = vector.extract_strided_slice %150 {offsets = [0, 0, 0], sizes = [2, 1, 128], strides = [1, 1, 1]} : vector<2x8x128xf32> to vector<2x1x128xf32>
      %152 = vector.shape_cast %151 : vector<2x1x128xf32> to vector<2x128xf32>
      %153 = arith.truncf %152 : vector<2x128xf32> to vector<2x128xbf16>
      %c0_71 = arith.constant 0 : index
      %c0_72 = arith.constant 0 : index
      %154 = vector.load %arg17[%c0_71, %c0_72] : memref<128x128xbf16, #tpu.memory_space<vmem>>, vector<128x128xbf16>
      %cst_73 = arith.constant dense<0.000000e+00> : vector<2x128xf32>
      %155 = tpu.matmul %153, %154, %cst_73 {dimension_numbers = #tpu.dot_dimension_numbers<[1], [0], [0], [1], [0, 0, 1, 1], [], []>} : vector<2x128xbf16>, vector<128x128xbf16>, vector<2x128xf32> -> vector<2x128xf32>
      %c0_74 = arith.constant 0 : index
      %c0_75 = arith.constant 0 : index
      %156 = vector.load %arg18[%c0_74, %c0_75] : memref<1x128xf32, #tpu.memory_space<vmem>>, vector<1x128xf32>
      %157 = vector.broadcast %156 : vector<1x128xf32> to vector<2x128xf32>
      %158 = arith.addf %155, %157 : vector<2x128xf32>
      %159 = math.tanh %158 : vector<2x128xf32>
      %160 = arith.truncf %159 : vector<2x128xf32> to vector<2x128xbf16>
      %c0_76 = arith.constant 0 : index
      %c0_77 = arith.constant 0 : index
      %161 = vector.load %arg19[%c0_76, %c0_77] : memref<128x128xbf16, #tpu.memory_space<vmem>>, vector<128x128xbf16>
      %cst_78 = arith.constant dense<0.000000e+00> : vector<2x128xf32>
      %162 = tpu.matmul %160, %161, %cst_78 {dimension_numbers = #tpu.dot_dimension_numbers<[1], [0], [0], [1], [0, 0, 1, 1], [], []>} : vector<2x128xbf16>, vector<128x128xbf16>, vector<2x128xf32> -> vector<2x128xf32>
      %c0_79 = arith.constant 0 : index
      %c0_80 = arith.constant 0 : index
      %163 = vector.load %arg20[%c0_79, %c0_80] : memref<1x128xf32, #tpu.memory_space<vmem>>, vector<1x128xf32>
      %164 = vector.broadcast %163 : vector<1x128xf32> to vector<2x128xf32>
      %165 = arith.addf %162, %164 : vector<2x128xf32>
      %c0_81 = arith.constant 0 : index
      %c0_82 = arith.constant 0 : index
      %166 = vector.load %arg21[%c0_81, %c0_82] : memref<2x128xf32, #tpu.memory_space<vmem>>, vector<2x128xf32>
      tpu.vector_store %arg21[%c0_81, %c0_82], %165 {strides = array<i32>} : memref<2x128xf32, #tpu.memory_space<vmem>>, vector<2x128xf32>,
    } else {
    }
    return
  }
  func.func @transform_0(%arg0: i32) -> (i32, i32) {
    %c0_i32 = arith.constant 0 : i32
    %c0_i32_0 = arith.constant 0 : i32
    %c0_i32_1 = arith.constant 0 : i32
    return %c0_i32, %c0_i32_0 : i32, i32
  }
  func.func @transform_1(%arg0: i32) -> (i32, i32) {
    %c0_i32 = arith.constant 0 : i32
    %c0_i32_0 = arith.constant 0 : i32
    %c0_i32_1 = arith.constant 0 : i32
    return %c0_i32, %c0_i32_0 : i32, i32
  }
  func.func @transform_2(%arg0: i32) -> (i32, i32) {
    %c0_i32 = arith.constant 0 : i32
    %c0_i32_0 = arith.constant 0 : i32
    %c0_i32_1 = arith.constant 0 : i32
    return %c0_i32, %c0_i32_0 : i32, i32
  }
  func.func @transform_3(%arg0: i32) -> (i32, i32) {
    %c0_i32 = arith.constant 0 : i32
    %c0_i32_0 = arith.constant 0 : i32
    %c0_i32_1 = arith.constant 0 : i32
    return %c0_i32, %c0_i32_0 : i32, i32
  }
  func.func @transform_4(%arg0: i32) -> (i32, i32, i32) {
    %c0_i32 = arith.constant 0 : i32
    %c0_i32_0 = arith.constant 0 : i32
    %c0_i32_1 = arith.constant 0 : i32
    return %arg0, %c0_i32, %c0_i32_0 : i32, i32, i32
  }
  func.func @transform_5(%arg0: i32) -> (i32, i32, i32) {
    %c0_i32 = arith.constant 0 : i32
    %c0_i32_0 = arith.constant 0 : i32
    %c0_i32_1 = arith.constant 0 : i32
    return %arg0, %c0_i32, %c0_i32_0 : i32, i32, i32
  }
  func.func @transform_6(%arg0: i32) -> (i32, i32, i32) {
    %c0_i32 = arith.constant 0 : i32
    %c0_i32_0 = arith.constant 0 : i32
    %c0_i32_1 = arith.constant 0 : i32
    return %arg0, %c0_i32, %c0_i32_0 : i32, i32, i32
  }
  func.func @transform_7(%arg0: i32) -> (i32, i32, i32) {
    %c0_i32 = arith.constant 0 : i32
    %c0_i32_0 = arith.constant 0 : i32
    %c0_i32_1 = arith.constant 0 : i32
    return %arg0, %c0_i32, %c0_i32_0 : i32, i32, i32
  }
  func.func @transform_8(%arg0: i32) -> (i32, i32, i32) {
    %c0_i32 = arith.constant 0 : i32
    %c0_i32_0 = arith.constant 0 : i32
    %c0_i32_1 = arith.constant 0 : i32
    return %arg0, %c0_i32, %c0_i32_0 : i32, i32, i32
  }
  func.func @transform_9(%arg0: i32) -> (i32, i32, i32) {
    %c0_i32 = arith.constant 0 : i32
    %c0_i32_0 = arith.constant 0 : i32
    %c0_i32_1 = arith.constant 0 : i32
    return %arg0, %c0_i32, %c0_i32_0 : i32, i32, i32
  }
  func.func @transform_10(%arg0: i32) -> (i32, i32, i32) {
    %c0_i32 = arith.constant 0 : i32
    %c0_i32_0 = arith.constant 0 : i32
    %c0_i32_1 = arith.constant 0 : i32
    return %arg0, %c0_i32, %c0_i32_0 : i32, i32, i32
  }
  func.func @transform_11(%arg0: i32) -> (i32, i32, i32) {
    %c0_i32 = arith.constant 0 : i32
    %c0_i32_0 = arith.constant 0 : i32
    %c0_i32_1 = arith.constant 0 : i32
    return %arg0, %c0_i32, %c0_i32_0 : i32, i32, i32
  }
  func.func @transform_12(%arg0: i32) -> (i32, i32, i32) {
    %c0_i32 = arith.constant 0 : i32
    %c0_i32_0 = arith.constant 0 : i32
    %c0_i32_1 = arith.constant 0 : i32
    return %arg0, %c0_i32, %c0_i32_0 : i32, i32, i32
  }
  func.func @transform_13(%arg0: i32) -> (i32, i32, i32) {
    %c0_i32 = arith.constant 0 : i32
    %c0_i32_0 = arith.constant 0 : i32
    %c0_i32_1 = arith.constant 0 : i32
    return %arg0, %c0_i32, %c0_i32_0 : i32, i32, i32
  }
  func.func @transform_14(%arg0: i32) -> (i32, i32, i32) {
    %c0_i32 = arith.constant 0 : i32
    %c0_i32_0 = arith.constant 0 : i32
    %c0_i32_1 = arith.constant 0 : i32
    return %arg0, %c0_i32, %c0_i32_0 : i32, i32, i32
  }
  func.func @transform_15(%arg0: i32) -> (i32, i32, i32) {
    %c0_i32 = arith.constant 0 : i32
    %c0_i32_0 = arith.constant 0 : i32
    %c0_i32_1 = arith.constant 0 : i32
    return %arg0, %c0_i32, %c0_i32_0 : i32, i32, i32
  }
  func.func @transform_16(%arg0: i32) -> (i32, i32) {
    %c0_i32 = arith.constant 0 : i32
    %c0_i32_0 = arith.constant 0 : i32
    %c0_i32_1 = arith.constant 0 : i32
    return %c0_i32, %c0_i32_0 : i32, i32
  }
  func.func @transform_17(%arg0: i32) -> (i32, i32) {
    %c0_i32 = arith.constant 0 : i32
    %c0_i32_0 = arith.constant 0 : i32
    %c0_i32_1 = arith.constant 0 : i32
    return %c0_i32, %c0_i32_0 : i32, i32
  }
  func.func @transform_18(%arg0: i32) -> (i32, i32) {
    %c0_i32 = arith.constant 0 : i32
    %c0_i32_0 = arith.constant 0 : i32
    %c0_i32_1 = arith.constant 0 : i32
    return %c0_i32, %c0_i32_0 : i32, i32
  }
  func.func @transform_19(%arg0: i32) -> (i32, i32) {
    %c0_i32 = arith.constant 0 : i32
    %c0_i32_0 = arith.constant 0 : i32
    %c0_i32_1 = arith.constant 0 : i32
    return %c0_i32, %c0_i32_0 : i32, i32
  }
  func.func @transform_20(%arg0: i32) -> (i32, i32) {
    %c0_i32 = arith.constant 0 : i32
    %c0_i32_0 = arith.constant 0 : i32
    %c0_i32_1 = arith.constant 0 : i32
    return %c0_i32, %c0_i32_0 : i32, i32
  }
}

</mosaic_0001>

<bundles_post_ra>
// kernel: sequence_classifier_forward.1
= control target key start
LH: loop header
LB: loop body
LE: loop exit
PB: predicated region body
PF: predicated region fallthrough
CT: control target
= control target key end

     0   :  { %s4097_s0 = inlined_call_operand.vmem [shape: f32[16,128], index: 0, kind: input, shape index: {}]   ;;  %s4098_s1 = inlined_call_operand.vmem [shape: f32[2,8], index: 1, kind: input, shape index: {}]   ;;  %s4099_s2 = inlined_call_operand.vmem [shape: f32[1,128], index: 2, kind: input, shape index: {}]   ;;  %s4100_s3 = inlined_call_operand.vmem [shape: f32[1,128], index: 3, kind: input, shape index: {}]   ;;  %s4101_s4 = inlined_call_operand.hbm [shape: bf16[2,128,384], index: 4, kind: input, shape index: {}]   ;;  %s4102_s5 = inlined_call_operand.vmem [shape: f32[2,1,384], index: 5, kind: input, shape index: {}]   ;;  %s4103_s6 = inlined_call_operand.vmem [shape: bf16[2,128,128], index: 6, kind: input, shape index: {}]   ;;  %s4104_s7 = inlined_call_operand.vmem [shape: f32[2,1,128], index: 7, kind: input, shape index: {}]   ;;  %s4105_s8 = inlined_call_operand.vmem [shape: f32[2,1,128], index: 8, kind: input, shape index: {}]   ;;  %s4106_s9 = inlined_call_operand.vmem [shape: f32[2,1,128], index: 9, kind: input, shape index: {}]   ;;  %s4107_s10 = inlined_call_operand.hbm [shape: bf16[2,128,256], index: 10, kind: input, shape index: {}]   ;;  %s4108_s11 = inlined_call_operand.vmem [shape: f32[2,1,256], index: 11, kind: input, shape index: {}]   ;;  %s4109_s12 = inlined_call_operand.hbm [shape: bf16[2,256,128], index: 12, kind: input, shape index: {}]   ;;  %s4110_s13 = inlined_call_operand.vmem [shape: f32[2,1,128], index: 13, kind: input, shape index: {}]   ;;  %s4111_s14 = inlined_call_operand.vmem [shape: f32[2,1,128], index: 14, kind: input, shape index: {}]   ;;  %s4112_s15 = inlined_call_operand.vmem [shape: f32[2,1,128], index: 15, kind: input, shape index: {}]   ;;  %s4113_s16 = inlined_call_operand.vmem [shape: bf16[128,128], index: 16, kind: input, shape index: {}]   ;;  %s4114_s17 = inlined_call_operand.vmem [shape: f32[1,128], index: 17, kind: input, shape index: {}]   ;;  %s4115_s18 = inlined_call_operand.vmem [shape: bf16[128,128], index: 18, kind: input, shape index: {}]   ;;  %s4116_s19 = inlined_call_operand.vmem [shape: f32[1,128], index: 19, kind: input, shape index: {}]   ;;  %s4117_s20 = inlined_call_operand.hbm [shape: f32[2,128], index: 20, kind: output, shape index: {}]  }
   0x1   :  { %4130 = sst [smem:[#allocation16_spill]] %s4097_s0 }
   0x2   :  { %4131 = sst [smem:[#allocation17_spill]] %s4098_s1 }
   0x3   :  { %4132 = sst [smem:[#allocation18_spill]] %s4099_s2 }
   0x4   :  { %4133 = sst [smem:[#allocation19_spill]] %s4100_s3 }
   0x5   :  { %4134 = sst [smem:[#allocation20_spill]] %s4101_s4 }
   0x6   :  { %4135 = sst [smem:[#allocation21_spill]] %s4102_s5 }
   0x7   :  { %4136 = sst [smem:[#allocation22_spill]] %s4103_s6 }
   0x8   :  { %4137 = sst [smem:[#allocation23_spill]] %s4107_s10 }
   0x9   :  { %4138 = sst [smem:[#allocation24_spill]] %s4109_s12 }
   0xa   :  { %4139 = sst [smem:[#allocation25_spill]] %s4112_s15 }
   0xb   :  { %4140 = sst [smem:[#allocation26_spill]] %s4113_s16 }
   0xc   :  { %4141 = sst [smem:[#allocation27_spill]] %s4114_s17 }
   0xd   :  { %4142 = sst [smem:[#allocation28_spill]] %s4115_s18 }
   0xe   :  { %4143 = sst [smem:[#allocation29_spill]] %s4116_s19 }
   0xf   :  { %4144 = sst [smem:[#allocation30_spill]] %s4117_s20 }
  0x10   :  { %25 = vsyncpa [#allocation4], 0 }
  0x11   :  { %27 = vsyncpa [#allocation4 + $0x1], 0 }
  0x12   :  { %28 = vsyncpa [#allocation7], 0 }
  0x13   :  { %30 = vsyncpa [#allocation7 + $0x1], 0 }
  0x14   :  { %31 = vsyncpa [#allocation5], 0  ;;  %s3534_s1 = smov 0   ;;  %s3536_s22 = smov 0  }
  0x15   :  { %s3538_s23 = smov 0   ;;  %s3540_s24 = smov 0  }
  0x16 LB: > { %4145 = sst [smem:[#allocation13_spill]] %s3406_s23  ;;  %s3553_s2 = sadd.s32 4294967295, %s3410_s24   ;;  %s3410_s24 = sphi %s3540_s24, %s4174_s24   ;;  %s3406_s23 = sphi %s3538_s23, %s4179_s23   ;;  %s3402_s22 = sphi %s3536_s22, %s4178_s22   ;;  %s3398_s1 = sphi %s3534_s1, %s4177_s1  }
  0x17   : > { %s3556_s25 = sadd.s32 1, %s3410_s24   ;;  %s128_s26 = sadd.s32 1, %s3406_s23 }
  0x18   : > { %4146 = sst [smem:[#allocation14_spill]] %s3556_s25  ;;  %s125_s3 = ssub.s32 %s3410_s24, %s3556_s25 }
  0x19   : > { %p126_p0 = scmp.eq.s32.totalorder %s125_s3, 0  ;;  %p135_p1 = scmp.ne.s32.totalorder %s3406_s23, %s3402_s22 }
  0x1a   : > { %p136_p2 = scmp.eq.s32.totalorder %s3410_s24, 0  ;;  %p141_p3 = scmp.ne.s32.totalorder %s3402_s22, %s3398_s1 }
  0x1b   : > { %s3566_s27 = scalar_select %p126_p0, %s3406_s23, %s128_s26  }
  0x1c   : > { %p137_p4 = por %p136_p2, %p135_p1  ;;  %p142_p5 = scmp.eq.s32.totalorder %s3553_s2, 0 }
  0x1d   : > { %4147 = sst [smem:[#allocation15_spill]] %s3566_s27  ;;  %p3069_p6 = scmp.lt.s32.totalorder %s3410_s24, 2 }
  0x1e   : > { %p3570_p7 = por %p142_p5, %p141_p3  ;;  %s3575_s4 = sand.u32 1, %s3406_s23  }
  0x1f   : > { %p3577_p8 = pnand %p3069_p6, %p137_p4  ;;  %s634_s30 = sand.u32 1, %s3410_s24  }
  0x20   : > { %s4148_s28 = scalar_select %p3570_p7, 1, 0 }
  0x21   : > { %s4124_s0 = sshll.u32 %s3575_s4, 7  ;;  %s4125_s21 = sshll.u32 %s3410_s24, 11 }
  0x22   : > { %s638_s1 = scalar_lea.vmem [#allocation6], %s4124_s0  ;;  %s4150_s10 = sld [smem:[#allocation23_spill]] }
  0x23   : > { %s645_s3 = sshll.u32 %s638_s1, 4  ;;  %s3595_s23 = scalar_lea.sflag [#allocation7], %s634_s30  ;;  %s3593_s3 = int_to_ptr.vmem [resolvable:$true] %s645_s3 }
  0x24   : > { %p3601_p10 = pneg %p3577_p8 }
  0x28   : > { %s3591_s25 = scalar_lea.hbm %s4150_s10, %s4125_s21  ;;  %s3257_s26 = scalar_lea.hbm %s4150_s10, 4096 }
  0x29   : > { %s3252_s20 = scalar_lea.hbm %s3591_s25, 2048  ;;  %p3258_p13 = scmp.lt.u32.totalorder %s3591_s25, %s4150_s10 }
  0x2a   : > { %p3253_p9 = scmp.ne.s32.totalorder %s3591_s25, %s3252_s20  ;;  %p3259_p0 = scmp.lt.u32.totalorder %s3257_s26, %s3252_s20 }
  0x2b   : > { %p3261_p2 = scmp.lt.u32.totalorder %s3252_s20, %s3591_s25 }
  0x2c   : > { %p3255_p11 = pnand %p3601_p10, %p3253_p9  ;;  %p3260_p1 = por %p3259_p0, %p3258_p13 }
  0x2e   : > { %p3256_p12 = pneg %p3255_p11  ;;  %p3262_p3 = por %p3261_p2, %p3260_p1 }
  0x30   : > { %p3263_p4 = pnand %p3262_p3, %p3256_p12 }
  0x32   : > { %3266 = shalt.err (!%p3263_p4)
}
  0x33   : > { %s3267_s30 = scalar_lea.vmem %s3593_s3, 2048  ;;  %s3412_s27 = smov [#allocation6]  }
  0x34   : > { %p3268_p5 = scmp.ne.s32.totalorder %s3593_s3, %s3267_s30  ;;  %s3272_s1 = sshll.u32 %s3412_s27, 4  ;;  %s3273_s1 = int_to_ptr.vmem [resolvable:$false] %s3272_s1 }
  0x35   : > { %s3274_s19 = scalar_lea.vmem %s3273_s1, 4096  ;;  %p3275_p11 = scmp.lt.s32.totalorder %s3593_s3, %s3273_s1 }
  0x36   : > { %p3270_p6 = pnand %p3268_p5, %p3601_p10  ;;  %p3276_p7 = scmp.lt.s32.totalorder %s3274_s19, %s3267_s30 }
  0x38   : > { %p3271_p9 = pneg %p3270_p6  ;;  %p3277_p13 = por %p3276_p7, %p3275_p11 }
  0x3a   : > { %p3278_p0 = pnand %p3277_p13, %p3271_p9 }
  0x3c   : > { %3281 = shalt.err (!%p3278_p0)
}
  0x3d   : > { %s3413_s20 = smov 128   ;;  %s3414_s21 = smov 8  }
  0x3e   : > { %3065 = dma.hbm_to_vmem [thread:$0]  (!%p3577_p8), %s3591_s25, 2048, %s3593_s3, %s3595_s23, %s3413_s20, %s3413_s20, %s3414_s21  }
  0x3f   : > { %s4152_s26 = sshll.u32 %s3410_s24, 11  ;;  %s4153_s12 = sld [smem:[#allocation24_spill]] }
  0x40   : > { %s4154_s19 = sshll.u32 %s3575_s4, 7  ;;  %p2710_p7 = scmp.ge.s32.totalorder %s3410_s24, 1 }
  0x41   : > { %s666_s10 = scalar_lea.vmem [#allocation8], %s4154_s19  ;;  %p699_p12 = scmp.lt.s32.totalorder %s3410_s24, 3 }
  0x42   : > { %s673_s17 = sshll.u32 %s666_s10, 4  ;;  %s3045_s18 = smul.u32 192, %s3575_s4  ;;  %s3635_s17 = int_to_ptr.vmem [resolvable:$true] %s673_s17 }
  0x43   : > { %p3639_p1 = pnand %p2710_p7, %p699_p12  ;;  %s3046_s25 = smul.u32 3072, %s3410_s24 }
  0x44   : > { %s4156_s21 = sld [smem:[#allocation20_spill]]  ;;  %s584_s10 = scalar_lea.vmem [#allocation3], %s3045_s18 }
  0x45   : > { %s3630_s1 = scalar_lea.hbm %s4153_s12, %s4152_s26  ;;  %s591_s26 = sshll.u32 %s584_s10, 4  ;;  %s3649_s26 = int_to_ptr.vmem [resolvable:$true] %s591_s26 }
  0x46   : > { %s4155_s16 = scalar_select %p3639_p1, 1, 0 }
  0x47   : > { %s581_s27 = scalar_lea.sflag [#allocation4], %s3575_s4 }
  0x4a   : > { %s3647_s30 = scalar_lea.hbm %s4156_s21, %s3046_s25  ;;  %s3287_s3 = scalar_lea.hbm %s4156_s21, 6144 }
  0x4b   : > { %s3282_s19 = scalar_lea.hbm %s3647_s30, 3072  ;;  %p3288_p5 = scmp.lt.u32.totalorder %s3647_s30, %s4156_s21 }
  0x4c   : > { %p3283_p2 = scmp.ne.s32.totalorder %s3647_s30, %s3282_s19  ;;  %p3289_p6 = scmp.lt.u32.totalorder %s3287_s3, %s3282_s19 }
  0x4d   : > { %p3291_p11 = scmp.lt.u32.totalorder %s3282_s19, %s3647_s30 }
  0x4e   : > { %p3285_p3 = pnand %p3283_p2, %p3601_p10  ;;  %p3290_p9 = por %p3289_p6, %p3288_p5 }
  0x50   : > { %p3286_p4 = pneg %p3285_p3  ;;  %p3292_p13 = por %p3291_p11, %p3290_p9 }
  0x52   : > { %p3293_p0 = pnand %p3292_p13, %p3286_p4 }
  0x54   : > { %3296 = shalt.err (!%p3293_p0)
}
  0x55   : > { %s3297_s18 = scalar_lea.vmem %s3649_s26, 3072  ;;  %s3415_s15 = smov [#allocation3]  }
  0x56   : > { %p3298_p7 = scmp.ne.s32.totalorder %s3649_s26, %s3297_s18  ;;  %s3302_s10 = sshll.u32 %s3415_s15, 4  ;;  %s3303_s10 = int_to_ptr.vmem [resolvable:$false] %s3302_s10 }
  0x57   : > { %s3304_s24 = scalar_lea.vmem %s3303_s10, 6144  ;;  %p3305_p3 = scmp.lt.s32.totalorder %s3649_s26, %s3303_s10 }
  0x58   : > { %p3300_p12 = pnand %p3298_p7, %p3601_p10  ;;  %p3306_p1 = scmp.lt.s32.totalorder %s3304_s24, %s3297_s18 }
  0x5a   : > { %p3301_p2 = pneg %p3300_p12  ;;  %p3307_p5 = por %p3306_p1, %p3305_p3 }
  0x5c   : > { %p3308_p6 = pnand %p3307_p5, %p3301_p2 }
  0x5e   : > { %3311 = shalt.err (!%p3308_p6)
}
  0x5f   : > { %s3416_s19 = smov 192   ;;  %s3417_s3 = smov 12  }
  0x60   : > { %3062 = dma.hbm_to_vmem [thread:$0]  (!%p3577_p8), %s3647_s30, 3072, %s3649_s26, %s581_s27, %s3416_s19, %s3416_s19, %s3417_s3  }
  0x61   : > { %s3312_s25 = scalar_lea.hbm %s3630_s1, 2048  ;;  %s3317_s15 = scalar_lea.hbm %s4153_s12, 4096 }
  0x62   : > { %p3313_p4 = scmp.ne.s32.totalorder %s3630_s1, %s3312_s25  ;;  %p3318_p11 = scmp.lt.u32.totalorder %s3630_s1, %s4153_s12 }
  0x63   : > { %p3319_p13 = scmp.lt.u32.totalorder %s3317_s15, %s3312_s25  ;;  %p3321_p7 = scmp.lt.u32.totalorder %s3312_s25, %s3630_s1 }
  0x64   : > { %p3315_p1 = pnand %p3313_p4, %p3601_p10 }
  0x65   : > { %p3320_p0 = por %p3319_p13, %p3318_p11 }
  0x66   : > { %p3316_p9 = pneg %p3315_p1 }
  0x67   : > { %p3322_p12 = por %p3321_p7, %p3320_p0 }
  0x69   : > { %p3323_p2 = pnand %p3322_p12, %p3316_p9 }
  0x6b   : > { %3326 = shalt.err (!%p3323_p2)
}
  0x6c   : > { %s3327_s4 = scalar_lea.vmem %s3635_s17, 2048  ;;  %s3418_s30 = smov [#allocation8]  }
  0x6d   : > { %p3328_p3 = scmp.ne.s32.totalorder %s3635_s17, %s3327_s4  ;;  %s3332_s26 = sshll.u32 %s3418_s30, 4  ;;  %s3333_s26 = int_to_ptr.vmem [resolvable:$false] %s3332_s26 }
  0x6e   : > { %s3334_s27 = scalar_lea.vmem %s3333_s26, 4096  ;;  %p3335_p4 = scmp.lt.s32.totalorder %s3635_s17, %s3333_s26 }
  0x6f   : > { %p3330_p5 = pnand %p3328_p3, %p3601_p10  ;;  %p3336_p1 = scmp.lt.s32.totalorder %s3334_s27, %s3327_s4 }
  0x71   : > { %p3331_p6 = pneg %p3330_p5  ;;  %p3337_p11 = por %p3336_p1, %p3335_p4 }
  0x73   : > { %p3338_p13 = pnand %p3337_p11, %p3331_p6 }
  0x75   : > { %3341 = shalt.err (!%p3338_p13)
}
  0x76   : > { %s3419_s19 = smov 64   ;;  %s3420_s3 = smov 4  }
  0x77   : > { %3068 = dma.hbm_to_vmem [thread:$0]  (!%p3577_p8), %s3630_s1, 2048, %s3635_s17, %s3595_s23, %s3419_s19, %s3419_s19, %s3420_s3  }
  0x78   : > { %p4157_p10 = scmp.ne.s32.totalorder %s4155_s16, 0 }
  0x79   : > { %s705_s0 = sand.u32 (!%p4157_p10), 1, %s3402_s22   ;;  %p4158_p9 = scmp.ne.s32.totalorder (!%p4157_p10), %s4148_s28, 0 }
  0x7a   : > { %703 = sbr.rel (%p4157_p10) target bundleno = 3504 (0xdb0), region = 100  ;;  %s706_s20 = scalar_lea.sflag (!%p4157_p10), [#allocation4], %s705_s0 }
  0x7b   : > { %s3047_s25 = smul.u32 (!%p4157_p10), 192, %s705_s0 }
  0x7d   : > { %s3700_s18 = scalar_lea.vmem (!%p4157_p10), [#allocation3], %s3047_s25 }
  0x81   : > { %3385 = dma.done.wait (%p4158_p9), %s706_s20, 3072  }
  0x82   : > { %3387 = vsyncadd (%p4158_p9), %s706_s20, 4294964224  ;;  %s714_s15 = sand.u32 1, %s3553_s2   ;;  %s2711_s29 = sshll.u32 %s705_s0, 7 }
  0x83   : > { %s715_s17 = scalar_lea.sflag [#allocation7], %s714_s15  ;;  %s3707_s23 = scalar_lea.vmem [#allocation6], %s2711_s29 }
  0x84   : > { %3389 = dma.done.wait (%p4158_p9), %s715_s17, 4096  }
  0x85   : > { %3391 = vsyncadd (%p4158_p9), %s715_s17, 4294963200  ;;  %p820_p8 = scmp.lt.s32.totalorder %s3553_s2, 1  ;;  %s4159_s6 = sld [smem:[#allocation22_spill]] }
  0x86   : > { %s4160_s5 = sld [smem:[#allocation21_spill]]  ;;  %s4161_s15 = sld [smem:[#allocation25_spill]] }
  0x87   : > { %s3715_s16 = scalar_select %p820_p8, %s3553_s2, 1 }
  0x88   : > { %s3759_s12 = scalar_lea.vmem [#allocation8], %s2711_s29  ;;  %p2716_p0 = scmp.ne.s32.totalorder %s3553_s2, 0 }
  0x89   : > { %s3048_s1 = smul.u32 3, %s3715_s16  ;;  %s2831_s10 = sshll.u32 %s3715_s16, 6 }
  0x8a   : > { %s837_s21 = scalar_lea.vmem %s4106_s9, %s3715_s16  ;;  %s2715_s24 = sshll.u32 %s3715_s16, 1 }
  0x8b   : > { %s3722_s28 = scalar_lea.vmem %s4159_s6, %s2831_s10  ;;  %s3745_s6 = scalar_lea.vmem %s4108_s11, %s2715_s24 }
  0x8c   : > { %s3731_s0 = scalar_lea.vmem %s4160_s5, %s3048_s1  ;;  %s844_s19 = scalar_lea.vmem %s4110_s13, %s3715_s16 }
  0x8d   : > { %s847_s27 = scalar_lea.vmem %s4111_s14, %s3715_s16  ;;  %s850_s5 = scalar_lea.vmem %s4161_s15, %s3715_s16 }
  0x8e   : > { %855 = sbr.rel (%p2716_p0) target bundleno = 465 (0x1d1), region = 116  ;;  %s4162_s10 = sld [smem:[#allocation16_spill]] (!%p2716_p0) }
  0x8f   : > { %s4163_s26 = sld [smem:[#allocation18_spill]] (!%p2716_p0)  ;;  %s4164_s25 = sld [smem:[#allocation19_spill]] (!%p2716_p0) }
  0x94   : > { %v856_v0 = vld [vmem:[%s4162_s10] sm:$0xff] (!%p2716_p0)  ;;  %v857_v1 = vld [vmem:[%s4162_s10 + $0x8] sm:$0xff] (!%p2716_p0) }
  0x95   : > { %860 = vadd.xlane.f32.xlu0 %v856_v0  ;;  %v2717_v17 = vld [vmem:[%s4163_s26] ss:$0 sm:$0xff] }
  0x96   : > { %v2718_v19 = vld [vmem:[%s4164_s25] ss:$0 sm:$0xff] }
  0x99   : > { %862 = vadd.xlane.f32.xlu0 %v857_v1 }
 0x122   : > { %v861_v2 = vpop.xlane.xlu0 %860 }
 0x123   : > { %v865_v3 = vmul.f32 0.0078125, %v861_v2 }
 0x125   : > { %v867_v4 = vsub.f32 %v856_v0, %v865_v3 }
 0x126   : > { %v863_v5 = vpop.xlane.xlu0 %862 }
 0x127   : > { %v866_v6 = vmul.f32 0.0078125, %v863_v5  ;;  %v869_v7 = vmul.f32 %v867_v4, %v867_v4 }
 0x129   : > { %v868_v8 = vsub.f32 %v857_v1, %v866_v6  ;;  %871 = vadd.xlane.f32.xlu1 %v869_v7 }
 0x12b   : > { %v870_v9 = vmul.f32 %v868_v8, %v868_v8 }
 0x12d   : > { %873 = vadd.xlane.f32.xlu1 %v870_v9 }
 0x1b6   : > { %v872_v10 = vpop.xlane.xlu1 %871 }
 0x1b7   : > { %v875_v11 = vmul.f32 0.0078125, %v872_v10 }
 0x1b9   : > { %v877_v12 = vadd.f32 1e-12, %v875_v11 }
 0x1ba   : > { %v874_v13 = vpop.xlane.xlu1 %873 }
 0x1bb   : > { %3118 = vrsqrt.f32 %v877_v12  ;;  %v876_v14 = vmul.f32 0.0078125, %v874_v13 }
 0x1bd   : > { %v878_v15 = vadd.f32 1e-12, %v876_v14 }
 0x1bf   : > { %3120 = vrsqrt.f32 %v878_v15 }
 0x1c5   : > { %v3119_v16 = vpop.eup %3118 }
 0x1c6   : > { %v881_v18 = vmul.f32 %v3119_v16, %v867_v4 }
 0x1c8   : > { %v889_v20 = vmul.f32 %v2717_v17, %v881_v18 }
 0x1c9   : > { %v3121_v21 = vpop.eup %3120 }
 0x1ca   : > { %v897_v22 = vadd.f32 %v2718_v19, %v889_v20  ;;  %v882_v23 = vmul.f32 %v3121_v21, %v868_v8 }
 0x1cc   : > { %899 = vst [vmem:[#allocation2] sm:$0xff] %v897_v22  ;;  %v890_v24 = vmul.f32 %v2717_v17, %v882_v23 }
 0x1ce   : > { %v898_v25 = vadd.f32 %v2718_v19, %v890_v24 }
 0x1d0   : > { %900 = vst [vmem:[#allocation2 + $0x8] sm:$0xff] %v898_v25 }
 0x1d1 PF: > { %v3122_v26 = vld [vmem:[%s3700_s18 + $0x4] ss:$12 sps:$4 sm:$0xff]   ;;  %v3124_v27 = vld [vmem:[%s3700_s18] ss:$12 sps:$4 sm:$0xff]   ;;  %v3421_v28 = vmov 0   ;;  %v3422_v29 = vmov 0.0   ;;  %v938_v55 = vlaneseq  ;;  %s4166_s4 = scalar_lea.vmem %s4104_s7, %s3715_s16  ;;  %s4167_s15 = scalar_lea.vmem %s4105_s8, %s3715_s16 }
 0x1d2   : > { %1113 = vmatprep.mubr.bf16.mxu0 %v3421_v28  ;;  %2913 = vmatprep.subr.bf16.mxu1 %v3422_v29  ;;  %v3125_v30 = vld [vmem:[%s3700_s18 + $0x1c] ss:$12 sps:$4 sm:$0xff]   ;;  %v3127_v31 = vld [vmem:[%s3700_s18 + $0x18] ss:$12 sps:$4 sm:$0xff]   ;;  %v3128_v32 = vld [vmem:[%s3700_s18 + $0x34] ss:$12 sps:$4 sm:$0xff]  }
 0x1d3   : > { %1081 = vmatprep.subr.bf16.mxu0 %v3122_v26  ;;  %v3130_v33 = vld [vmem:[%s3700_s18 + $0x30] ss:$12 sps:$4 sm:$0xff]   ;;  %v3131_v34 = vld [vmem:[%s3700_s18 + $0x4c] ss:$12 sps:$4 sm:$0xff]   ;;  %v3133_v35 = vld [vmem:[%s3700_s18 + $0x48] ss:$12 sps:$4 sm:$0xff]  }
 0x1d4   : > { %1082 = vmatpush1.bf16.msra.mxu0 %v3124_v27  ;;  %v3134_v36 = vld [vmem:[%s3700_s18 + $0x64] ss:$12 sps:$4 sm:$0xff]   ;;  %v3146_v37 = vld [vmem:[%s3700_s18 + $0x8] ss:$12 sps:$4 sm:$0xff]   ;;  %v3147_v38 = vld [vmem:[%s3700_s18 + $0x20] ss:$12 sps:$4 sm:$0xff]  }
 0x1d5   : > { %1083 = vmatprep.subr.bf16.mxu0 %v3125_v30  ;;  %2914 = vmatpush3.bf16.msra.mxu1 %v3146_v37  ;;  %v3136_v39 = vld [vmem:[%s3700_s18 + $0x60] ss:$12 sps:$4 sm:$0xff]   ;;  %v3137_v40 = vld [vmem:[%s3700_s18 + $0x7c] ss:$12 sps:$4 sm:$0xff]   ;;  %v3139_v41 = vld [vmem:[%s3700_s18 + $0x78] ss:$12 sps:$4 sm:$0xff]  }
 0x1d6   : > { %2915 = vmatprep.subr.bf16.mxu1 %v3422_v29  ;;  %v3140_v42 = vld [vmem:[%s3700_s18 + $0x94] ss:$12 sps:$4 sm:$0xff]   ;;  %v3148_v43 = vld [vmem:[%s3700_s18 + $0x38] ss:$12 sps:$4 sm:$0xff]   ;;  %v3149_v44 = vld [vmem:[%s3700_s18 + $0x50] ss:$12 sps:$4 sm:$0xff]  }
 0x1d7   : > { %v3142_v45 = vld [vmem:[%s3700_s18 + $0x90] ss:$12 sps:$4 sm:$0xff]   ;;  %v3143_v46 = vld [vmem:[%s3700_s18 + $0xac] ss:$12 sps:$4 sm:$0xff]   ;;  %v3150_v47 = vld [vmem:[%s3700_s18 + $0x68] ss:$12 sps:$4 sm:$0xff]  }
 0x1d8   : > { %1084 = vmatpush1.bf16.msra.mxu0 %v3127_v31  ;;  %v3145_v48 = vld [vmem:[%s3700_s18 + $0xa8] ss:$12 sps:$4 sm:$0xff]   ;;  %v3802_v50 = vld [vmem:[#allocation2 + $0x8] sm:$0xff]  ;;  %v3151_v51 = vld [vmem:[%s3700_s18 + $0x80] ss:$12 sps:$4 sm:$0xff]   ;;  %vm3423_vm0 = vmmov 0  }
 0x1d9   : > { %1085 = vmatprep.subr.bf16.mxu0 %v3128_v32  ;;  %2916 = vmatpush3.bf16.msra.mxu1 %v3147_v38  ;;  %v3800_v49 = vld [vmem:[#allocation2] sm:$0xff]  ;;  %v3152_v53 = vld [vmem:[%s3700_s18 + $0x98] ss:$12 sps:$4 sm:$0xff]   ;;  %v3821_v56 = vshrl.u32 %v938_v55, 7  ;;  %vm1217_vm1 = vcmask 523264   ;;  %vm1335_vm2 = vcmask 1043456  }
 0x1da   : > { %2917 = vmatprep.subr.bf16.mxu1 %v3422_v29  ;;  %v903_v52 = vpack.c.bf16 %v3802_v50, %v3800_v49  ;;  %v3153_v54 = vld [vmem:[%s3700_s18 + $0xb0] ss:$12 sps:$4 sm:$0xff]   ;;  %2929 = vmatprep.mubr.msk.bf16.mxu1 %vm3423_vm0, %v3422_v29  ;;  %s3424_s18 = smov 64   ;;  %v3425_v26 = vmov 1966171168   ;;  %s4165_s17 = sld [smem:[#allocation17_spill]] }
 0x1db   : > { %v3824_v57 = vsub.s32 0, %v3821_v56  ;;  %v936_v58 = vld [vmem:[%s3731_s0] sm:$0x7]  ;;  %v944_v59 = vsub.s32 1, %v3821_v56  ;;  %v948_v14 = vsub.s32 2, %v3821_v56  ;;  %v1192_v27 = vunpack.c.l.s4 %v3425_v26  ;;  %p2806_p7 = scmp.ne.s32.totalorder %s3553_s2, 1 }
 0x1dc   : > { %1086 = vmatpush1.bf16.msra.mxu0 %v3130_v33  ;;  %vm1311_vm3 = vcmask 64512   ;;  %vm3427_vm4 = vmmov (!%p2806_p7), 0   ;;  %vm2304_vm5 = vcmask (!%p2806_p7), 1041409   ;;  %s4172_s1 = sld [smem:[#allocation29_spill]] (!%p2806_p7) }
 0x1dd   : > { %1087 = vmatprep.subr.bf16.mxu0 %v3131_v34  ;;  %2918 = vmatpush3.bf16.msra.mxu1 %v3148_v43  ;;  %v941_v60 = vrot.slane %v936_v58, %v3824_v57  ;;  %v945_v61 = vrot.slane %v936_v58, %v944_v59  ;;  %v949_v15 = vrot.slane %v936_v58, %v948_v14  ;;  %v1193_v30 = vunpack.c.0.s8 %v1192_v27  ;;  %v3157_v14 = vld [vmem:[%s3722_s28 + $0x18] sm:$0xff]  }
 0x1de   : > { %2919 = vmatprep.subr.bf16.mxu1 %v3422_v29 }
 0x1df   : > { %v1196_v31 = vsub.s32 %v1193_v30, %v3821_v56 }
 0x1e0   : > { %1088 = vmatpush1.bf16.msra.mxu0 %v3133_v35  ;;  %v2747_v32 = vld.sshfl [vmem:[%s4165_s17] sm:$0x11 pattern:$0x75316420] }
 0x1e1   : > { %1089 = vmatprep.subr.bf16.mxu0 %v3134_v36  ;;  %2920 = vmatpush3.bf16.msra.mxu1 %v3149_v44  ;;  %v1197_v33 = vrot.slane %v2747_v32, %v1196_v31  ;;  %v1190_v35 = vcombine.high %v2747_v32, %v2747_v32 }
 0x1e2   : > { %2921 = vmatprep.subr.bf16.mxu1 %v3422_v29 }
 0x1e3   : > { %v3864_v34 = vrot.slane %v1197_v33, %v3824_v57 }
 0x1e4   : > { %1090 = vmatpush1.bf16.msra.mxu0 %v3136_v39  ;;  %v1204_v39 = vrot.slane %v1190_v35, %v1196_v31 }
 0x1e5   : > { %1091 = vmatprep.subr.bf16.mxu0 %v3137_v40  ;;  %2922 = vmatpush3.bf16.msra.mxu1 %v3150_v47 }
 0x1e6   : > { %2923 = vmatprep.subr.bf16.mxu1 %v3422_v29  ;;  %v3869_v43 = vrot.slane %v1204_v39, %v3824_v57 }
 0x1e8   : > { %1092 = vmatpush1.bf16.msra.mxu0 %v3139_v41 }
 0x1e9   : > { %1093 = vmatprep.subr.bf16.mxu0 %v3140_v42  ;;  %2924 = vmatpush3.bf16.msra.mxu1 %v3151_v51 }
 0x1ea   : > { %2925 = vmatprep.subr.bf16.mxu1 %v3422_v29 }
 0x1ec   : > { %1094 = vmatpush1.bf16.msra.mxu0 %v3142_v45 }
 0x1ed   : > { %1095 = vmatprep.subr.bf16.mxu0 %v3143_v46  ;;  %2926 = vmatpush3.bf16.msra.mxu1 %v3152_v53 }
 0x1ee   : > { %2927 = vmatprep.subr.bf16.mxu1 %v3422_v29 }
 0x1f0   : > { %1096 = vmatpush1.bf16.msra.mxu0 %v3145_v48 }
 0x1f1   : > { %2945 = vmatprep.subr.bf16.mxu0 %v3422_v29  ;;  %2928 = vmatpush3.bf16.msra.mxu1 %v3153_v54 }
 0x1f2   : > { %2933 = vmatprep.subr.bf16.mxu1 %v3422_v29 }
 0x1f3   : > { %1114 = vmatmul.mubr.bf16.vlgmr.msra.gmra.mrb[0].mxu0 %v903_v52 }
 0x1f4   : > { %2947 = vmatprep.mubr.msk.bf16.mxu0 %vm3423_vm0, %v3422_v29  ;;  %2930 = vmatmul.mubr.bf16.vlgmr.msra.gmra.mrb[0].mxu1 %v903_v52 }
 0x1f5   : > { %2935 = vmatprep.mubr.msk.bf16.mxu1 %vm3423_vm0, %v3422_v29 }
 0x2c6   : > { %v1115_v62 = vpop.f32.mrb[0].mxu0 }
 0x2c7   : > { %v1116_v63 = vadd.f32 %v1115_v62, %v941_v60  ;;  %v1117_v0 = vpop.f32.mrb[1].mxu0  ;;  %v1158_v16 = vpop.f32.mrb[0].mxu1 }
 0x2c8   : > { %v1118_v1 = vadd.f32 %v1117_v0, %v945_v61  ;;  %v1119_v2 = vpop.f32.mrb[2].mxu0  ;;  %v1159_v17 = vadd.f32 %v1158_v16, %v949_v15  ;;  %v2931_v18 = vpop.f32.mrb[1].mxu1 }
 0x2c9   : > { %v1120_v3 = vadd.f32 %v1119_v2, %v941_v60  ;;  %v1121_v4 = vpop.f32.mrb[3].mxu0  ;;  %v2836_v10 = vpack.c.bf16 %v1116_v63, %v1116_v63  ;;  %v1161_v19 = vpop.f32.mrb[2].mxu1 }
 0x2ca   : > { %v3831_v5 = vpack.c.bf16 %v1118_v1, %v1116_v63  ;;  %v1122_v6 = vadd.f32 %v1121_v4, %v945_v61  ;;  %v3849_v20 = vpack.c.bf16 %v1159_v17, %v1159_v17  ;;  %v1162_v21 = vadd.f32 %v1161_v19, %v949_v15  ;;  %v2932_v22 = vpop.f32.mrb[3].mxu1 }
 0x2cb   : > { %v2837_v12 = vpack.c.bf16 %v1120_v3, %v1120_v3 }
 0x2cc   : > { %v2834_v7 = vpack.c.bf16 %v1122_v6, %v1120_v3  ;;  %v1216_v8 = vrot.slane %v3831_v5, 4  ;;  %v1337_v23 = vsel %vm1335_vm2, %v3849_v20, 0  ;;  %v3853_v24 = vpack.c.bf16 %v1162_v21, %v1162_v21 }
 0x2cd   : > { %2946 = vmatpush3.bf16.msra.mxu0 %v1337_v23 }
 0x2ce   : > { %1566 = vrot.lane.b32.xlu1 %v2834_v7, %s3424_s18  ;;  %v1222_v9 = vsel %vm1217_vm1, %v1216_v8, 0  ;;  %v1264_v11 = vrot.slane %v2834_v7, 4  ;;  %v1383_v25 = vsel %vm1335_vm2, %v3853_v24, 0  ;;  %2957 = vmatprep.subr.bf16.mxu0 %v3422_v29 }
 0x2cf   : > { %2934 = vmatpush3.bf16.xpose.msra.mxu1 %v1222_v9 }
 0x2d0   : > { %2939 = vmatprep.subr.bf16.mxu1 %v3422_v29  ;;  %v1269_v13 = vsel %vm1217_vm1, %v1264_v11, 0  ;;  %v3154_v11 = vld [vmem:[%s3722_s28] sm:$0xff]  }
 0x2d2   : > { %1518 = vrot.lane.b32.xlu1 %v2836_v10, %s3424_s18 }
 0x2d6   : > { %1570 = vrot.lane.b32.xlu1 %v2837_v12, %s3424_s18  ;;  %2936 = vmatmul.mubr.msk.bf16.vlgmr.msra.gmra.mrb[4].mxu1 %vm1217_vm1, %v3831_v5  ;;  %v3155_v12 = vld [vmem:[%s3722_s28 + $0x8] sm:$0xff]  }
 0x2d7   : > { %2940 = vmatpush3.bf16.xpose.msra.mxu1 %v1269_v13  ;;  %2941 = vmatprep.mubr.msk.bf16.mxu1 %vm3423_vm0, %v3422_v29  ;;  %v3156_v13 = vld [vmem:[%s3722_s28 + $0x10] sm:$0xff]  }
 0x2d8   : > { %2951 = vmatprep.subr.bf16.mxu1 %v3422_v29 }
 0x2de   : > { %2942 = vmatmul.mubr.msk.bf16.vlgmr.msra.gmra.mrb[8].mxu1 %vm1217_vm1, %v2834_v7 }
 0x2df   : > { %2953 = vmatprep.mubr.msk.bf16.mxu1 %vm3423_vm0, %v3422_v29  ;;  %2952 = vmatpush3.bf16.msra.mxu1 %v1383_v25 }
 0x2e0   : > { %2969 = vmatprep.subr.bf16.mxu1 %v3422_v29 }
 0x340   : > { %v1567_v52 = vpop.permute.xlu1 %1566 }
 0x341   : > { %v1568_v9 = vrot.slane %v1567_v52, 4 }
 0x343   : > { %v1576_v10 = vsel %vm1217_vm1, %v1568_v9, 0 }
 0x344   : > { %v1519_v53 = vpop.permute.xlu1 %1518 }
 0x348   : > { %v1571_v54 = vpop.permute.xlu1 %1570 }
 0x3a9   : > { %v1258_v36 = vpop.f32.mrb[4].mxu1 }
 0x3aa   : > { %v1259_v37 = vadd.f32 %v1258_v36, %v3864_v34  ;;  %v2937_v38 = vpop.f32.mrb[5].mxu1 }
 0x3ab   : > { %v1261_v40 = vpop.f32.mrb[6].mxu1 }
 0x3ac   : > { %v2938_v41 = vpop.f32.mrb[7].mxu1  ;;  %v1312_v42 = vsel %vm1311_vm3, %v1259_v37, -inf }
 0x3ad   : > { %1313 = vmax.xlane.f32.xlu1 %v1312_v42 }
 0x3b1   : > { %v1305_v44 = vpop.f32.mrb[8].mxu1 }
 0x3b2   : > { %v1306_v45 = vadd.f32 %v1305_v44, %v3869_v43  ;;  %v2943_v46 = vpop.f32.mrb[9].mxu1 }
 0x3b3   : > { %v1308_v47 = vpop.f32.mrb[10].mxu1 }
 0x3b4   : > { %v2944_v48 = vpop.f32.mrb[11].mxu1  ;;  %v1315_v51 = vsel %vm1311_vm3, %v1306_v45, -inf }
 0x3b5   : > { %1316 = vmax.xlane.f32.xlu0 %v1315_v51 }
 0x3cb   : > { %1514 = vrot.lane.b32.xlu0 %v3831_v5, %s3424_s18 }
 0x43a   : > { %v1314_v55 = vpop.xlane.xlu1 %1313 }
 0x43b   : > { %v1318_v58 = vsub.f32 %v1259_v37, %v1314_v55 }
 0x43d   : > { %v1320_v60 = vmul.f32 1.442695, %v1318_v58 }
 0x43f   : > { %3202 = vpow2.f32 %v1320_v60 }
 0x442   : > { %v1317_v61 = vpop.xlane.xlu0 %1316 }
 0x443   : > { %v1319_v62 = vsub.f32 %v1306_v45, %v1317_v61 }
 0x445   : > { %v1322_v63 = vmul.f32 1.442695, %v1319_v62 }
 0x446   : > { %v1515_v3 = vpop.permute.xlu0 %1514 }
 0x447   : > { %3204 = vpow2.f32 %v1322_v63  ;;  %v1516_v4 = vrot.slane %v1515_v3, 4 }
 0x449   : > { %v3203_v0 = vpop.eup %3202  ;;  %v1524_v8 = vsel %vm1217_vm1, %v1516_v4, 0 }
 0x44a   : > { %v1324_v1 = vsel %vm1311_vm3, %v3203_v0, 0.0  ;;  %v1330_v2 = vpack.c.bf16 %v3203_v0, %v3203_v0 }
 0x44b   : > { %1325 = vadd.xlane.f32.xlu0 %v1324_v1  ;;  %v3158_v1 = vld [vmem:[%s3722_s28 + $0x20] sm:$0xff]  }
 0x44c   : > { %2948 = vmatmul.mubr.msk.bf16.vlgmr.msra.gmra.mrb[4].mxu0 %vm1311_vm3, %v1330_v2 }
 0x44d   : > { %2965 = vmatprep.mubr.msk.bf16.mxu0 %vm3423_vm0, %v3422_v29  ;;  %2958 = vmatpush3.bf16.msra.mxu0 %v3154_v11 }
 0x44e   : > { %2959 = vmatprep.subr.bf16.mxu0 %v3422_v29 }
 0x451   : > { %v3205_v5 = vpop.eup %3204  ;;  %2960 = vmatpush3.bf16.msra.mxu0 %v3155_v12 }
 0x452   : > { %v1327_v6 = vsel %vm1311_vm3, %v3205_v5, 0.0  ;;  %v1331_v7 = vpack.c.bf16 %v3205_v5, %v3205_v5  ;;  %2961 = vmatprep.subr.bf16.mxu0 %v3422_v29 }
 0x453   : > { %1328 = vadd.xlane.f32.xlu1 %v1327_v6  ;;  %v3159_v6 = vld [vmem:[%s3722_s28 + $0x28] sm:$0xff]  }
 0x454   : > { %2954 = vmatmul.mubr.msk.bf16.vlgmr.msra.gmra.mrb[12].mxu1 %vm1311_vm3, %v1331_v7  ;;  %v3160_v7 = vld [vmem:[%s3722_s28 + $0x30] sm:$0xff]  }
 0x455   : > { %2970 = vmatpush3.bf16.xpose.msra.mxu1 %v1524_v8  ;;  %2971 = vmatprep.mubr.msk.bf16.mxu1 %vm3423_vm0, %v3422_v29  ;;  %v3161_v8 = vld [vmem:[%s3722_s28 + $0x38] sm:$0xff]  }
 0x456   : > { %2975 = vmatprep.subr.bf16.mxu1 %v3422_v29  ;;  %2962 = vmatpush3.bf16.msra.mxu0 %v3156_v13 }
 0x457   : > { %2963 = vmatprep.subr.bf16.mxu0 %v3422_v29 }
 0x45a   : > { %2964 = vmatpush3.bf16.msra.mxu0 %v3157_v14 }
 0x45b   : > { %2981 = vmatprep.subr.bf16.mxu0 %v3422_v29 }
 0x45c   : > { %2972 = vmatmul.mubr.msk.bf16.vlgmr.msra.gmra.mrb[16].mxu1 %vm1217_vm1, %v1519_v53 }
 0x45d   : > { %2976 = vmatpush3.bf16.xpose.msra.mxu1 %v1576_v10  ;;  %2977 = vmatprep.mubr.msk.bf16.mxu1 %vm3423_vm0, %v3422_v29 }
 0x45e   : > { %2987 = vmatprep.subr.bf16.mxu1 %v3422_v29 }
 0x461   : > { %1638 = vrot.lane.b32.xlu0 %v3849_v20, %s3424_s18 }
 0x464   : > { %2978 = vmatmul.mubr.msk.bf16.vlgmr.msra.gmra.mrb[20].mxu1 %vm1217_vm1, %v1571_v54 }
 0x465   : > { %2989 = vmatprep.mubr.msk.bf16.mxu1 %vm3423_vm0, %v3422_v29 }
 0x4d8   : > { %v1326_v15 = vpop.xlane.xlu0 %1325 }
 0x4d9   : > { %3206 = vrcp.f32 %v1326_v15 }
 0x4dc   : > { %v1639_v30 = vpop.permute.xlu0 %1638 }
 0x4dd   : > { %v1644_v35 = vsel %vm1335_vm2, %v1639_v30, 0 }
 0x4e0   : > { %v1329_v16 = vpop.xlane.xlu1 %1328 }
 0x4e1   : > { %3208 = vrcp.f32 %v1329_v16 }
 0x4e3   : > { %v3207_v21 = vpop.eup %3206 }
 0x4eb   : > { %v3209_v22 = vpop.eup %3208 }
 0x51f   : > { %v1373_v17 = vpop.f32.mrb[4].mxu0 }
 0x520   : > { %v2949_v18 = vpop.f32.mrb[5].mxu0  ;;  %v1427_v25 = vmul.f32 %v3207_v21, %v1373_v17 }
 0x521   : > { %v1376_v19 = vpop.f32.mrb[6].mxu0 }
 0x522   : > { %v2950_v20 = vpop.f32.mrb[7].mxu0 }
 0x527   : > { %v1419_v23 = vpop.f32.mrb[12].mxu1 }
 0x528   : > { %v1428_v26 = vmul.f32 %v3209_v22, %v1419_v23  ;;  %v2955_v27 = vpop.f32.mrb[13].mxu1  ;;  %v2757_v22 = vld [vmem:[%s4166_s4] ss:$0 sm:$0xff]  ;;  %s4170_s4 = sld [smem:[#allocation28_spill]] (!%p2806_p7) }
 0x529   : > { %v1422_v31 = vpop.f32.mrb[14].mxu1 }
 0x52a   : > { %v1429_v32 = vpack.c.bf16 %v1428_v26, %v1427_v25  ;;  %v2956_v33 = vpop.f32.mrb[15].mxu1 }
 0x52c   : > { %2966 = vmatmul.mubr.msk.bf16.vlgmr.msra.gmra.mrb[8].mxu0 %vm1217_vm1, %v1429_v32 }
 0x52d   : > { %2982 = vmatpush3.bf16.msra.mxu0 %v1644_v35  ;;  %2983 = vmatprep.mubr.msk.bf16.mxu0 %vm3423_vm0, %v3422_v29 }
 0x52e   : > { %2993 = vmatprep.subr.bf16.mxu0 %v3422_v29 }
 0x52f   : > { %v1560_v36 = vpop.f32.mrb[16].mxu1 }
 0x530   : > { %v1561_v37 = vadd.f32 %v1560_v36, %v3864_v34  ;;  %v2973_v38 = vpop.f32.mrb[17].mxu1 }
 0x531   : > { %v1563_v39 = vpop.f32.mrb[18].mxu1  ;;  %v3164_v38 = vld [vmem:[%s3707_s23 + $0x4] ss:$8 sps:$4 sm:$0xff]  }
 0x532   : > { %v2974_v40 = vpop.f32.mrb[19].mxu1  ;;  %v1618_v41 = vsel %vm1311_vm3, %v1561_v37, -inf  ;;  %v3167_v39 = vld [vmem:[%s3707_s23 + $0x14] ss:$8 sps:$4 sm:$0xff]  }
 0x533   : > { %1619 = vmax.xlane.f32.xlu1 %v1618_v41  ;;  %v3165_v40 = vld [vmem:[%s3707_s23 + $0x10] ss:$8 sps:$4 sm:$0xff]  }
 0x537   : > { %v1612_v42 = vpop.f32.mrb[20].mxu1 }
 0x538   : > { %v1613_v44 = vadd.f32 %v1612_v42, %v3869_v43  ;;  %v2979_v45 = vpop.f32.mrb[21].mxu1 }
 0x539   : > { %v1615_v46 = vpop.f32.mrb[22].mxu1 }
 0x53a   : > { %v2980_v47 = vpop.f32.mrb[23].mxu1  ;;  %v1621_v48 = vsel %vm1311_vm3, %v1613_v44, -inf }
 0x53b   : > { %1622 = vmax.xlane.f32.xlu1 %v1621_v48  ;;  %v3170_v48 = vld [vmem:[%s3707_s23 + $0x24] ss:$8 sps:$4 sm:$0xff]  }
 0x54c   : > { %1686 = vrot.lane.b32.xlu1 %v3853_v24, %s3424_s18 }
 0x5c0   : > { %v1620_v51 = vpop.xlane.xlu1 %1619 }
 0x5c1   : > { %v1624_v34 = vsub.f32 %v1561_v37, %v1620_v51  ;;  %v3162_v37 = vld [vmem:[%s3707_s23] ss:$8 sps:$4 sm:$0xff]  }
 0x5c2   : > { %v3168_v51 = vld [vmem:[%s3707_s23 + $0x20] ss:$8 sps:$4 sm:$0xff]  }
 0x5c3   : > { %v1626_v52 = vmul.f32 1.442695, %v1624_v34  ;;  %v3173_v34 = vld [vmem:[%s3707_s23 + $0x34] ss:$8 sps:$4 sm:$0xff]  }
 0x5c5   : > { %3210 = vpow2.f32 %v1626_v52  ;;  %v3171_v52 = vld [vmem:[%s3707_s23 + $0x30] ss:$8 sps:$4 sm:$0xff]  }
 0x5c8   : > { %v1623_v53 = vpop.xlane.xlu1 %1622 }
 0x5c9   : > { %v1625_v54 = vsub.f32 %v1613_v44, %v1623_v53  ;;  %v3176_v53 = vld [vmem:[%s3707_s23 + $0x44] ss:$8 sps:$4 sm:$0xff]  }
 0x5cb   : > { %v1628_v55 = vmul.f32 1.442695, %v1625_v54  ;;  %v3174_v54 = vld [vmem:[%s3707_s23 + $0x40] ss:$8 sps:$4 sm:$0xff]  }
 0x5cc   : > { %v1687_v58 = vpop.permute.xlu1 %1686 }
 0x5cd   : > { %3212 = vpow2.f32 %v1628_v55  ;;  %v1692_v43 = vsel %vm1335_vm2, %v1687_v58, 0  ;;  %v3179_v55 = vld [vmem:[%s3707_s23 + $0x54] ss:$8 sps:$4 sm:$0xff]   ;;  %v3177_v58 = vld [vmem:[%s3707_s23 + $0x50] ss:$8 sps:$4 sm:$0xff]  }
 0x5ce   : > { %2988 = vmatpush3.bf16.msra.mxu1 %v1692_v43  ;;  %v3182_v43 = vld [vmem:[%s3707_s23 + $0x64] ss:$8 sps:$4 sm:$0xff]  }
 0x5cf   : > { %v3211_v60 = vpop.eup %3210  ;;  %1969 = vmatprep.subr.bf16.mxu1 %v3164_v38 }
 0x5d0   : > { %v1630_v61 = vsel %vm1311_vm3, %v3211_v60, 0.0  ;;  %v1636_v62 = vpack.c.bf16 %v3211_v60, %v3211_v60  ;;  %v3180_v60 = vld [vmem:[%s3707_s23 + $0x60] ss:$8 sps:$4 sm:$0xff]  }
 0x5d1   : > { %1631 = vadd.xlane.f32.xlu1 %v1630_v61  ;;  %v3185_v61 = vld [vmem:[%s3707_s23 + $0x74] ss:$8 sps:$4 sm:$0xff]  }
 0x5d2   : > { %2984 = vmatmul.mubr.msk.bf16.vlgmr.msra.gmra.mrb[12].mxu0 %vm1311_vm3, %v1636_v62  ;;  %v3183_v62 = vld [vmem:[%s3707_s23 + $0x70] ss:$8 sps:$4 sm:$0xff]  }
 0x5d3   : > { %3001 = vmatprep.mubr.msk.bf16.mxu0 %vm3423_vm0, %v3422_v29  ;;  %2994 = vmatpush3.bf16.msra.mxu0 %v3158_v1 }
 0x5d4   : > { %2995 = vmatprep.subr.bf16.mxu0 %v3422_v29 }
 0x5d7   : > { %v3213_v24 = vpop.eup %3212  ;;  %2996 = vmatpush3.bf16.msra.mxu0 %v3159_v6 }
 0x5d8   : > { %v1633_v63 = vsel %vm1311_vm3, %v3213_v24, 0.0  ;;  %v1637_v0 = vpack.c.bf16 %v3213_v24, %v3213_v24  ;;  %2997 = vmatprep.subr.bf16.mxu0 %v3422_v29 }
 0x5d9   : > { %1634 = vadd.xlane.f32.xlu0 %v1633_v63 }
 0x5da   : > { %2990 = vmatmul.mubr.msk.bf16.vlgmr.msra.gmra.mrb[24].mxu1 %vm1311_vm3, %v1637_v0 }
 0x5db   : > { %2001 = vmatprep.mubr.bf16.mxu1 %v3421_v28  ;;  %2998 = vmatpush3.bf16.msra.mxu0 %v3160_v7 }
 0x5dc   : > { %2999 = vmatprep.subr.bf16.mxu0 %v3422_v29  ;;  %1970 = vmatpush1.bf16.msra.mxu1 %v3162_v37 }
 0x5dd   : > { %1971 = vmatprep.subr.bf16.mxu1 %v3167_v39 }
 0x5df   : > { %3000 = vmatpush3.bf16.msra.mxu0 %v3161_v8 }
 0x5e0   : > { %1972 = vmatpush1.bf16.msra.mxu1 %v3165_v40 }
 0x5e1   : > { %1973 = vmatprep.subr.bf16.mxu1 %v3170_v48 }
 0x5e4   : > { %1974 = vmatpush1.bf16.msra.mxu1 %v3168_v51 }
 0x5e5   : > { %1975 = vmatprep.subr.bf16.mxu1 %v3173_v34 }
 0x5e8   : > { %1976 = vmatpush1.bf16.msra.mxu1 %v3171_v52 }
 0x5e9   : > { %1977 = vmatprep.subr.bf16.mxu1 %v3176_v53 }
 0x5ec   : > { %1978 = vmatpush1.bf16.msra.mxu1 %v3174_v54 }
 0x5ed   : > { %1979 = vmatprep.subr.bf16.mxu1 %v3179_v55 }
 0x5f0   : > { %1980 = vmatpush1.bf16.msra.mxu1 %v3177_v58 }
 0x5f1   : > { %1981 = vmatprep.subr.bf16.mxu1 %v3182_v43 }
 0x5f4   : > { %1982 = vmatpush1.bf16.msra.mxu1 %v3180_v60 }
 0x5f5   : > { %1983 = vmatprep.subr.bf16.mxu1 %v3185_v61 }
 0x5f8   : > { %1984 = vmatpush1.bf16.msra.mxu1 %v3183_v62 }
 0x5ff   : > { %v1499_v2 = vpop.f32.mrb[8].mxu0 }
 0x600   : > { %v2967_v3 = vpop.f32.mrb[9].mxu0  ;;  %v1512_v23 = vadd.f32 %v2757_v22, %v1499_v2 }
 0x601   : > { %v1502_v4 = vpop.f32.mrb[10].mxu0 }
 0x602   : > { %v2968_v5 = vpop.f32.mrb[11].mxu0  ;;  %v1513_v26 = vadd.f32 %v2757_v22, %v1502_v4  ;;  %v3195_v22 = vld [vmem:[%s3759_s12 + $0x20] sm:$0xff]  }
 0x603   : > { %v2769_v5 = vld [vmem:[%s4167_s15] ss:$0 sm:$0xff] }
 0x65e   : > { %v1632_v9 = vpop.xlane.xlu1 %1631 }
 0x65f   : > { %3214 = vrcp.f32 %v1632_v9 }
 0x666   : > { %v1635_v28 = vpop.xlane.xlu0 %1634 }
 0x667   : > { %3216 = vrcp.f32 %v1635_v28  ;;  %v2770_v28 = vld [vmem:[%s837_s21] ss:$0 sm:$0xff]  ;;  %s4171_s21 = sld [smem:[#allocation27_spill]] (!%p2806_p7) }
 0x669   : > { %v3215_v14 = vpop.eup %3214 }
 0x671   : > { %v3217_v15 = vpop.eup %3216 }
 0x6a5   : > { %v1680_v10 = vpop.f32.mrb[12].mxu0 }
 0x6a6   : > { %v2985_v11 = vpop.f32.mrb[13].mxu0  ;;  %v1736_v17 = vmul.f32 %v3215_v14, %v1680_v10  ;;  %v3186_v14 = vld [vmem:[%s3759_s12 + $0x40] sm:$0xff]  }
 0x6a7   : > { %v1683_v12 = vpop.f32.mrb[14].mxu0  ;;  %2873 = vmatprep.subr.bf16.mxu0 %v3186_v14 }
 0x6a8   : > { %v2986_v13 = vpop.f32.mrb[15].mxu0 }
 0x6ad   : > { %v1728_v16 = vpop.f32.mrb[24].mxu1 }
 0x6ae   : > { %v1737_v18 = vmul.f32 %v3217_v15, %v1728_v16  ;;  %v2991_v19 = vpop.f32.mrb[25].mxu1  ;;  %v3187_v15 = vld [vmem:[%s3759_s12] sm:$0xff]   ;;  %v3188_v16 = vld [vmem:[%s3759_s12 + $0x48] sm:$0xff]  }
 0x6af   : > { %v1731_v20 = vpop.f32.mrb[26].mxu1  ;;  %v3191_v19 = vld [vmem:[%s3759_s12 + $0x10] sm:$0xff]  }
 0x6b0   : > { %v1738_v21 = vpack.c.bf16 %v1737_v18, %v1736_v17  ;;  %v2992_v29 = vpop.f32.mrb[27].mxu1  ;;  %v3189_v17 = vld [vmem:[%s3759_s12 + $0x8] sm:$0xff]   ;;  %v3190_v18 = vld [vmem:[%s3759_s12 + $0x50] sm:$0xff]   ;;  %v3192_v20 = vld [vmem:[%s3759_s12 + $0x58] sm:$0xff]  }
 0x6b1   : > { %v3194_v29 = vld [vmem:[%s3759_s12 + $0x60] sm:$0xff]  }
 0x6b2   : > { %3002 = vmatmul.mubr.msk.bf16.vlgmr.msra.gmra.mrb[16].mxu0 %vm1217_vm1, %v1738_v21  ;;  %v3193_v21 = vld [vmem:[%s3759_s12 + $0x18] sm:$0xff]  }
 0x6b3   : > { %2874 = vmatpush3.bf16.msra.mxu0 %v3187_v15 }
 0x6b4   : > { %2875 = vmatprep.subr.bf16.mxu0 %v3188_v16 }
 0x6b7   : > { %2876 = vmatpush3.bf16.msra.mxu0 %v3189_v17 }
 0x6b8   : > { %2877 = vmatprep.subr.bf16.mxu0 %v3190_v18  ;;  %v2787_v18 = vld [vmem:[%s844_s19] ss:$0 sm:$0xff] }
 0x6bb   : > { %2878 = vmatpush3.bf16.msra.mxu0 %v3191_v19 }
 0x6bc   : > { %2879 = vmatprep.subr.bf16.mxu0 %v3192_v20 }
 0x6bf   : > { %2880 = vmatpush3.bf16.msra.mxu0 %v3193_v21 }
 0x6c0   : > { %2881 = vmatprep.subr.bf16.mxu0 %v3194_v29 }
 0x6c3   : > { %2882 = vmatpush3.bf16.msra.mxu0 %v3195_v22 }
 0x785   : > { %v1808_v25 = vpop.f32.mrb[16].mxu0 }
 0x786   : > { %v1815_v27 = vadd.f32 %v1808_v25, %v1512_v23  ;;  %v3003_v30 = vpop.f32.mrb[17].mxu0  ;;  %v3196_v23 = vld [vmem:[%s3759_s12 + $0x68] sm:$0xff]  }
 0x787   : > { %v1811_v31 = vpop.f32.mrb[18].mxu0  ;;  %v3197_v25 = vld [vmem:[%s3759_s12 + $0x28] sm:$0xff]   ;;  %2883 = vmatprep.subr.bf16.mxu0 %v3196_v23  ;;  %v3200_v30 = vld [vmem:[%s3759_s12 + $0x78] sm:$0xff]  }
 0x788   : > { %v1816_v32 = vadd.f32 %v1811_v31, %v1513_v26  ;;  %v3004_v33 = vpop.f32.mrb[19].mxu0  ;;  %v1817_v35 = vadd.f32 %v1815_v27, %v3800_v49  ;;  %v3198_v26 = vld [vmem:[%s3759_s12 + $0x70] sm:$0xff]   ;;  %2884 = vmatpush3.bf16.msra.mxu0 %v3197_v25  ;;  %v3201_v31 = vld [vmem:[%s3759_s12 + $0x38] sm:$0xff]  }
 0x789   : > { %v3199_v27 = vld [vmem:[%s3759_s12 + $0x30] sm:$0xff]   ;;  %2885 = vmatprep.subr.bf16.mxu0 %v3198_v26 }
 0x78a   : > { %1821 = vadd.xlane.f32.xlu0 %v1817_v35  ;;  %v1818_v36 = vadd.f32 %v1816_v32, %v3802_v50  ;;  %v1877_v32 = vld [vmem:[%s3745_s6] sm:$0x3] }
 0x78b   : > { %v1882_v33 = vrot.slane %v1877_v32, %v3824_v57 }
 0x78c   : > { %1823 = vadd.xlane.f32.xlu1 %v1818_v36  ;;  %2886 = vmatpush3.bf16.msra.mxu0 %v3199_v27 }
 0x78d   : > { %2887 = vmatprep.subr.bf16.mxu0 %v3200_v30 }
 0x790   : > { %2888 = vmatpush3.bf16.msra.mxu0 %v3201_v31 }
 0x817   : > { %v1822_v41 = vpop.xlane.xlu0 %1821 }
 0x818   : > { %v1826_v42 = vmul.f32 0.0078125, %v1822_v41 }
 0x819   : > { %v1824_v44 = vpop.xlane.xlu1 %1823 }
 0x81a   : > { %v1828_v49 = vsub.f32 %v1817_v35, %v1826_v42  ;;  %v1827_v50 = vmul.f32 0.0078125, %v1824_v44  ;;  %v1886_v35 = vrot.slane %v1877_v32, %v944_v59 }
 0x81c   : > { %v1829_v45 = vsub.f32 %v1818_v36, %v1827_v50  ;;  %v1830_v46 = vmul.f32 %v1828_v49, %v1828_v49 }
 0x81e   : > { %1832 = vadd.xlane.f32.xlu0 %v1830_v46  ;;  %v1831_v47 = vmul.f32 %v1829_v45, %v1829_v45 }
 0x820   : > { %1834 = vadd.xlane.f32.xlu1 %v1831_v47 }
 0x8ab   : > { %v1833_v24 = vpop.xlane.xlu0 %1832 }
 0x8ac   : > { %v1836_v63 = vmul.f32 0.0078125, %v1833_v24 }
 0x8ad   : > { %v1835_v0 = vpop.xlane.xlu1 %1834 }
 0x8ae   : > { %v1838_v1 = vadd.f32 1e-12, %v1836_v63  ;;  %v1837_v2 = vmul.f32 0.0078125, %v1835_v0 }
 0x8b0   : > { %3218 = vrsqrt.f32 %v1838_v1  ;;  %v1839_v3 = vadd.f32 1e-12, %v1837_v2 }
 0x8b2   : > { %3220 = vrsqrt.f32 %v1839_v3 }
 0x8ba   : > { %v3219_v4 = vpop.eup %3218 }
 0x8bb   : > { %v1842_v6 = vmul.f32 %v3219_v4, %v1828_v49 }
 0x8bc   : > { %v3221_v7 = vpop.eup %3220 }
 0x8bd   : > { %v1843_v8 = vmul.f32 %v3221_v7, %v1829_v45  ;;  %v1850_v9 = vmul.f32 %v2769_v5, %v1842_v6 }
 0x8bf   : > { %v1851_v10 = vmul.f32 %v2769_v5, %v1843_v8  ;;  %v3963_v11 = vadd.f32 %v2770_v28, %v1850_v9 }
 0x8c1   : > { %v3965_v12 = vadd.f32 %v2770_v28, %v1851_v10 }
 0x8c3   : > { %v1860_v13 = vpack.c.bf16 %v3965_v12, %v3963_v11 }
 0x8c5   : > { %2002 = vmatmul.mubr.bf16.vlgmr.msra.gmra.mrb[28].mxu1 %v1860_v13 }
 0x998   : > { %v2003_v36 = vpop.f32.mrb[28].mxu1 }
 0x999   : > { %v2004_v37 = vadd.f32 %v2003_v36, %v1882_v33  ;;  %v2005_v38 = vpop.f32.mrb[29].mxu1 }
 0x99a   : > { %v2006_v39 = vadd.f32 %v2005_v38, %v1886_v35  ;;  %v2007_v40 = vpop.f32.mrb[30].mxu1 }
 0x99b   : > { %v2016_v41 = vmul.f32 0.044715, %v2004_v37  ;;  %v2008_v42 = vadd.f32 %v2007_v40, %v1882_v33  ;;  %v2009_v44 = vpop.f32.mrb[31].mxu1  ;;  %v2012_v4 = vmul.f32 0.5, %v2004_v37 }
 0x99c   : > { %v2017_v49 = vmul.f32 0.044715, %v2006_v39  ;;  %v2010_v50 = vadd.f32 %v2009_v44, %v1886_v35  ;;  %v2013_v7 = vmul.f32 0.5, %v2006_v39 }
 0x99d   : > { %v2020_v45 = vmul.f32 %v2016_v41, %v2004_v37  ;;  %v2018_v46 = vmul.f32 0.044715, %v2008_v42  ;;  %v2014_v5 = vmul.f32 0.5, %v2008_v42 }
 0x99e   : > { %v2021_v47 = vmul.f32 %v2017_v49, %v2006_v39  ;;  %v2019_v48 = vmul.f32 0.044715, %v2010_v50  ;;  %v2015_v8 = vmul.f32 0.5, %v2010_v50  ;;  %v2804_v49 = vld [vmem:[%s847_s27] ss:$0 sm:$0xff]  ;;  %s4169_s27 = sld [smem:[#allocation26_spill]] (!%p2806_p7) }
 0x99f   : > { %v2024_v51 = vmul.f32 %v2020_v45, %v2004_v37  ;;  %v2022_v34 = vmul.f32 %v2018_v46, %v2008_v42  ;;  %v2805_v46 = vld [vmem:[%s850_s5] ss:$0 sm:$0xff] }
 0x9a0   : > { %v2025_v57 = vmul.f32 %v2021_v47, %v2006_v39  ;;  %v2023_v52 = vmul.f32 %v2019_v48, %v2010_v50 }
 0x9a1   : > { %v2028_v56 = vadd.f32 %v2024_v51, %v2004_v37  ;;  %v2026_v59 = vmul.f32 %v2022_v34, %v2008_v42 }
 0x9a2   : > { %v2027_v53 = vmul.f32 %v2023_v52, %v2010_v50  ;;  %v2029_v54 = vadd.f32 %v2025_v57, %v2006_v39 }
 0x9a3   : > { %v2032_v55 = vmul.f32 0.7978846, %v2028_v56  ;;  %v2030_v58 = vadd.f32 %v2026_v59, %v2008_v42  ;;  %v3426_v56 = vmov (!%p2806_p7), 0.0  }
 0x9a4   : > { %v2031_v43 = vadd.f32 %v2027_v53, %v2010_v50  ;;  %v2033_v60 = vmul.f32 0.7978846, %v2029_v54  ;;  %v3234_v52 = vld [vmem:[%s4169_s27] sm:$0xff] (!%p2806_p7)   ;;  %3005 = vmatprep.subr.bf16.mxu0 (!%p2806_p7), %v3426_v56  ;;  %3025 = vmatprep.subr.bf16.mxu1 (!%p2806_p7), %v3426_v56  ;;  %v3235_v59 = vld [vmem:[%s4169_s27 + $0x8] sm:$0xff] (!%p2806_p7)   ;;  %v3236_v53 = vld [vmem:[%s4169_s27 + $0x10] sm:$0xff] (!%p2806_p7)  }
 0x9a5   : > { %3222 = vtanh.f32 %v2032_v55  ;;  %v2034_v61 = vmul.f32 0.7978846, %v2030_v58  ;;  %3041 = vmatprep.mubr.msk.bf16.mxu1 (!%p2806_p7), %vm3427_vm4, %v3426_v56  ;;  %v3242_v54 = vld [vmem:[%s4170_s4] sm:$0xff] (!%p2806_p7)   ;;  %v3237_v55 = vld [vmem:[%s4169_s27 + $0x18] sm:$0xff] (!%p2806_p7)   ;;  %v3243_v58 = vld [vmem:[%s4170_s4 + $0x8] sm:$0xff] (!%p2806_p7)  }
 0x9a6   : > { %v2035_v62 = vmul.f32 0.7978846, %v2031_v43  ;;  %3224 = vtanh.f32 %v2033_v60  ;;  %3026 = vmatpush3.bf16.msra.mxu1 (!%p2806_p7), %v3242_v54  ;;  %v3238_v43 = vld [vmem:[%s4169_s27 + $0x20] sm:$0xff] (!%p2806_p7)   ;;  %v3244_v60 = vld [vmem:[%s4170_s4 + $0x10] sm:$0xff] (!%p2806_p7)  }
 0x9a7   : > { %3226 = vtanh.f32 %v2034_v61  ;;  %3027 = vmatprep.subr.bf16.mxu1 (!%p2806_p7), %v3426_v56 }
 0x9a8   : > { %3228 = vtanh.f32 %v2035_v62  ;;  %v3239_v62 = vld [vmem:[%s4169_s27 + $0x28] sm:$0xff] (!%p2806_p7)  }
 0x9aa   : > { %3028 = vmatpush3.bf16.msra.mxu1 (!%p2806_p7), %v3243_v58 }
 0x9ab   : > { %3029 = vmatprep.subr.bf16.mxu1 (!%p2806_p7), %v3426_v56 }
 0x9ae   : > { %3030 = vmatpush3.bf16.msra.mxu1 (!%p2806_p7), %v3244_v60 }
 0x9af   : > { %v3223_v24 = vpop.eup %3222  ;;  %3031 = vmatprep.subr.bf16.mxu1 (!%p2806_p7), %v3426_v56 }
 0x9b0   : > { %v3225_v63 = vpop.eup %3224  ;;  %v2040_v0 = vadd.f32 1.0, %v3223_v24 }
 0x9b1   : > { %v3227_v1 = vpop.eup %3226  ;;  %v2041_v2 = vadd.f32 1.0, %v3225_v63 }
 0x9b2   : > { %v3229_v3 = vpop.eup %3228  ;;  %v2042_v6 = vadd.f32 1.0, %v3227_v1  ;;  %v2044_v28 = vmul.f32 %v2040_v0, %v2012_v4  ;;  %v3245_v0 = vld [vmem:[%s4170_s4 + $0x18] sm:$0xff] (!%p2806_p7)   ;;  %v3240_v1 = vld [vmem:[%s4169_s27 + $0x30] sm:$0xff] (!%p2806_p7)  }
 0x9b3   : > { %v2043_v9 = vadd.f32 1.0, %v3229_v3  ;;  %v2045_v13 = vmul.f32 %v2041_v2, %v2013_v7  ;;  %3032 = vmatpush3.bf16.msra.mxu1 (!%p2806_p7), %v3245_v0  ;;  %v3241_v4 = vld [vmem:[%s4169_s27 + $0x38] sm:$0xff] (!%p2806_p7)   ;;  %v3246_v7 = vld [vmem:[%s4170_s4 + $0x20] sm:$0xff] (!%p2806_p7)  }
 0x9b4   : > { %v2046_v10 = vmul.f32 %v2042_v6, %v2014_v5  ;;  %3033 = vmatprep.subr.bf16.mxu1 (!%p2806_p7), %v3426_v56 }
 0x9b5   : > { %v2047_v14 = vmul.f32 %v2043_v9, %v2015_v8  ;;  %v3247_v8 = vld [vmem:[%s4170_s4 + $0x28] sm:$0xff] (!%p2806_p7)   ;;  %v3248_v9 = vld [vmem:[%s4170_s4 + $0x30] sm:$0xff] (!%p2806_p7)  }
 0x9b6   : > { %v2048_v15 = vpack.c.bf16 %v2046_v10, %v2044_v28  ;;  %v3249_v28 = vld [vmem:[%s4170_s4 + $0x38] sm:$0xff] (!%p2806_p7)   ;;  %v2807_v10 = vld [vmem:[%s4171_s21] ss:$0 sm:$0xff] (!%p2806_p7) }
 0x9b7   : > { %v2049_v16 = vpack.c.bf16 %v2047_v14, %v2045_v13  ;;  %3034 = vmatpush3.bf16.msra.mxu1 (!%p2806_p7), %v3246_v7 }
 0x9b8   : > { %3035 = vmatprep.subr.bf16.mxu1 (!%p2806_p7), %v3426_v56 }
 0x9b9   : > { %2217 = vmatprep.mubr.bf16.mxu0 %v2049_v16 }
 0x9ba   : > { %2218 = vmatmul.mubr.bf16.vlgmr.msra.gmra.mrb[20].mxu0 %v2048_v15 }
 0x9bb   : > { %3006 = vmatpush3.bf16.msra.mxu0 (!%p2806_p7), %v3234_v52  ;;  %3021 = vmatprep.mubr.msk.bf16.mxu0 (!%p2806_p7), %vm3427_vm4, %v3426_v56 }
 0x9bc   : > { %3007 = vmatprep.subr.bf16.mxu0 (!%p2806_p7), %v3426_v56  ;;  %3036 = vmatpush3.bf16.msra.mxu1 (!%p2806_p7), %v3247_v8 }
 0x9bd   : > { %3037 = vmatprep.subr.bf16.mxu1 (!%p2806_p7), %v3426_v56 }
 0x9bf   : > { %3008 = vmatpush3.bf16.msra.mxu0 (!%p2806_p7), %v3235_v59 }
 0x9c0   : > { %3009 = vmatprep.subr.bf16.mxu0 (!%p2806_p7), %v3426_v56  ;;  %3038 = vmatpush3.bf16.msra.mxu1 (!%p2806_p7), %v3248_v9 }
 0x9c1   : > { %3039 = vmatprep.subr.bf16.mxu1 (!%p2806_p7), %v3426_v56 }
 0x9c3   : > { %3010 = vmatpush3.bf16.msra.mxu0 (!%p2806_p7), %v3236_v53 }
 0x9c4   : > { %3011 = vmatprep.subr.bf16.mxu0 (!%p2806_p7), %v3426_v56  ;;  %3040 = vmatpush3.bf16.msra.mxu1 (!%p2806_p7), %v3249_v28 }
 0x9c7   : > { %3012 = vmatpush3.bf16.msra.mxu0 (!%p2806_p7), %v3237_v55 }
 0x9c8   : > { %3013 = vmatprep.subr.bf16.mxu0 (!%p2806_p7), %v3426_v56 }
 0x9cb   : > { %3014 = vmatpush3.bf16.msra.mxu0 (!%p2806_p7), %v3238_v43 }
 0x9cc   : > { %3015 = vmatprep.subr.bf16.mxu0 (!%p2806_p7), %v3426_v56 }
 0x9cf   : > { %3016 = vmatpush3.bf16.msra.mxu0 (!%p2806_p7), %v3239_v62 }
 0x9d0   : > { %3017 = vmatprep.subr.bf16.mxu0 (!%p2806_p7), %v3426_v56 }
 0x9d3   : > { %3018 = vmatpush3.bf16.msra.mxu0 (!%p2806_p7), %v3240_v1 }
 0x9d4   : > { %3019 = vmatprep.subr.bf16.mxu0 (!%p2806_p7), %v3426_v56 }
 0x9d7   : > { %3020 = vmatpush3.bf16.msra.mxu0 (!%p2806_p7), %v3241_v4 }
 0xa8d   : > { %v2889_v17 = vpop.f32.mrb[20].mxu0 }
 0xa8e   : > { %v2890_v19 = vpop.f32.mrb[21].mxu0 }
 0xa8f   : > { %v2891_v20 = vadd.f32 %v2890_v19, %v2889_v17  ;;  %v2892_v21 = vpop.f32.mrb[22].mxu0 }
 0xa90   : > { %v2893_v29 = vpop.f32.mrb[23].mxu0 }
 0xa91   : > { %v2220_v22 = vadd.f32 %v2891_v20, %v2787_v18  ;;  %v2894_v23 = vadd.f32 %v2893_v29, %v2892_v21  ;;  %v2816_v20 = vld [vmem:[%s4172_s1] ss:$0 sm:$0xff] (!%p2806_p7) }
 0xa93   : > { %v2223_v25 = vadd.f32 %v2894_v23, %v2787_v18  ;;  %v2226_v26 = vadd.f32 %v2220_v22, %v3963_v11 }
 0xa95   : > { %2230 = vadd.xlane.f32.xlu0 %v2226_v26  ;;  %v2227_v27 = vadd.f32 %v2223_v25, %v3965_v12 }
 0xa97   : > { %2232 = vadd.xlane.f32.xlu1 %v2227_v27 }
 0xb22   : > { %v2231_v30 = vpop.xlane.xlu0 %2230 }
 0xb23   : > { %v2234_v31 = vmul.f32 0.0078125, %v2231_v30 }
 0xb24   : > { %v2233_v32 = vpop.xlane.xlu1 %2232 }
 0xb25   : > { %v2236_v33 = vsub.f32 %v2226_v26, %v2234_v31  ;;  %v2235_v35 = vmul.f32 0.0078125, %v2233_v32 }
 0xb27   : > { %v2237_v36 = vsub.f32 %v2227_v27, %v2235_v35  ;;  %v2238_v37 = vmul.f32 %v2236_v33, %v2236_v33 }
 0xb29   : > { %2240 = vadd.xlane.f32.xlu0 %v2238_v37  ;;  %v2239_v38 = vmul.f32 %v2237_v36, %v2237_v36 }
 0xb2b   : > { %2242 = vadd.xlane.f32.xlu1 %v2239_v38 }
 0xbb6   : > { %v2241_v39 = vpop.xlane.xlu0 %2240 }
 0xbb7   : > { %v2244_v40 = vmul.f32 0.0078125, %v2241_v39 }
 0xbb8   : > { %v2243_v41 = vpop.xlane.xlu1 %2242 }
 0xbb9   : > { %v2246_v11 = vadd.f32 1e-12, %v2244_v40  ;;  %v2245_v42 = vmul.f32 0.0078125, %v2243_v41 }
 0xbbb   : > { %3230 = vrsqrt.f32 %v2246_v11  ;;  %v2247_v12 = vadd.f32 1e-12, %v2245_v42 }
 0xbbd   : > { %3232 = vrsqrt.f32 %v2247_v12 }
 0xbc5   : > { %v3231_v44 = vpop.eup %3230 }
 0xbc6   : > { %v2250_v50 = vmul.f32 %v3231_v44, %v2236_v33 }
 0xbc7   : > { %v3233_v45 = vpop.eup %3232 }
 0xbc8   : > { %v2258_v47 = vmul.f32 %v2804_v49, %v2250_v50  ;;  %v2251_v48 = vmul.f32 %v3233_v45, %v2237_v36  ;;  %2273 = sbr.rel (%p2806_p7) target bundleno = 3473 (0xd91), region = 120 }
 0xbca   : > { %v2266_v51 = vadd.f32 %v2805_v46, %v2258_v47  ;;  %v2259_v34 = vmul.f32 %v2804_v49, %v2251_v48 }
 0xbcc   : > { %2268 = vst [vmem:[#allocation2] sm:$0xff] %v2266_v51  ;;  %v2267_v57 = vadd.f32 %v2805_v46, %v2259_v34  ;;  %v2274_v24 = vpack.c.bf16 (!%p2806_p7), %v2266_v51, %v2266_v51 }
 0xbce   : > { %2269 = vst [vmem:[#allocation2 + $0x8] sm:$0xff] %v2267_v57  ;;  %v2275_v61 = vpack.c.bf16 (!%p2806_p7), %v2267_v57, %v2267_v57  ;;  %v2301_v2 = vunpack.c.l.b16 (!%p2806_p7), %v2274_v24 }
 0xbd0   : > { %v2302_v63 = vunpack.c.l.b16 %v2275_v61 }
 0xbd2   : > { %v2303_v3 = vrot.slane %v2302_v63, 7 }
 0xbd4   : > { %v2305_v5 = vsel %vm2304_vm5, %v2303_v3, %v2301_v2 }
 0xbd5   : > { %v2306_v6 = vpack.c.b16 %v2305_v5, %v2305_v5 }
 0xbd7   : > { %3022 = vmatmul.mubr.bf16.vlgmr.msra.gmra.mrb[0].mxu0 %v2306_v6 }
 0xcaa   : > { %v2390_v13 = vpop.f32.mrb[0].mxu0 }
 0xcab   : > { %v2391_v14 = vadd.f32 %v2807_v10, %v2390_v13  ;;  %v3023_v15 = vpop.f32.mrb[1].mxu0 }
 0xcac   : > { %v2393_v16 = vpop.f32.mrb[2].mxu0 }
 0xcad   : > { %3250 = vtanh.f32 %v2391_v14  ;;  %v3024_v17 = vpop.f32.mrb[3].mxu0 }
 0xcb7   : > { %v3251_v18 = vpop.eup %3250 }
 0xcb8   : > { %v2397_v19 = vpack.c.bf16 %v3251_v18, %v3251_v18 }
 0xcba   : > { %3042 = vmatmul.mubr.bf16.vlgmr.msra.gmra.mrb[0].mxu1 %v2397_v19 }
 0xd8d   : > { %v2503_v21 = vpop.f32.mrb[0].mxu1 }
 0xd8e   : > { %v2504_v29 = vadd.f32 %v2816_v20, %v2503_v21  ;;  %v3043_v22 = vpop.f32.mrb[1].mxu1 }
 0xd8f   : > { %v2506_v23 = vpop.f32.mrb[2].mxu1 }
 0xd90   : > { %2509 = vst [vmem:[#allocation9] sm:$0x3] %v2504_v29  ;;  %v3044_v25 = vpop.f32.mrb[3].mxu1 }
 0xd91 PF: > { %p3070_p12 = scmp.eq.s32.totalorder %s3553_s2, 1  ;;  %s3428_s3 = smov [#allocation9]  }
 0xd92   : > { %s2517_s25 = sshll.u32 %s3428_s3, 4  ;;  %s2518_s25 = int_to_ptr.vmem [resolvable:$true] %s2517_s25 }
 0xd93   : > { %s3342_s18 = scalar_lea.vmem %s2518_s25, 32  ;;  %p3349_p6 = scmp.lt.s32.totalorder %s2518_s25, %s2518_s25 }
 0xd94   : > { %p3343_p2 = scmp.ne.s32.totalorder %s2518_s25, %s3342_s18  ;;  %p3350_p4 = scmp.lt.s32.totalorder %s3342_s18, %s3342_s18 }
 0xd96   : > { %p3344_p3 = pnand %p3343_p2, %p3070_p12  ;;  %p3351_p1 = por %p3350_p4, %p3349_p6 }
 0xd98   : > { %p3345_p5 = pneg %p3344_p3 }
 0xd9a   : > { %p3352_p11 = pnand %p3351_p1, %p3345_p5 }
 0xd9c   : > { %3355 = shalt.err (!%p3352_p11)
}
 0xd9d   : > { %s4173_s5 = sld [smem:[#allocation30_spill]] }
 0xda3   : > { %s3356_s20 = scalar_lea.hbm %s4173_s5, 32 }
 0xda4   : > { %p3357_p13 = scmp.ne.s32.totalorder %s4173_s5, %s3356_s20  ;;  %p3362_p8 = scmp.lt.u32.totalorder %s3356_s20, %s4173_s5 }
 0xda6   : > { %p3358_p10 = pnand %p3357_p13, %p3070_p12 }
 0xda8   : > { %p3359_p9 = pneg %p3358_p10 }
 0xdaa   : > { %p3364_p0 = pnand %p3362_p8, %p3359_p9 }
 0xdac   : > { %3367 = shalt.err (!%p3364_p0)
}
 0xdad   : > { %3056 = dma.vmem_to_hbm [thread:$0]  (%p3070_p12), %s2518_s25, 32, %s4173_s5, [#allocation5]  }
 0xdae   : > { %3393 = dma.done.wait (%p3070_p12), [#allocation5], 32  }
 0xdaf   : > { %3395 = vsyncadd (%p3070_p12), [#allocation5], 4294967264 }
 0xdb0 PF: > { %s4174_s24 = sld [smem:[#allocation14_spill]]  ;;  %s4175_s23 = sld [smem:[#allocation13_spill]] }
 0xdb1   : > { %s4176_s26 = sld [smem:[#allocation15_spill]]  ;;  %s4177_s1 = smov %s3402_s22 }
 0xdb6   : > { %p34_p7 = scmp.ge.s32.totalorder %s4174_s24, 4   ;;  %s4178_s22 = smov %s4175_s23 }
 0xdb7   : > { %s4179_s23 = smov %s4176_s26 }
 0xdb8   :  { %36 = sbr.rel (!%p34_p7) target bundleno = 22 (0x16), region = 196 }
 0xdbf   :  { %2530 = vsyncpa [#allocation4], 1 }
 0xdc0   :  { %2532 = vsyncpa [#allocation4 + $0x1], 1 }
 0xdc1   :  { %2533 = vsyncpa [#allocation7], 1 }
 0xdc2   :  { %2535 = vsyncpa [#allocation7 + $0x1], 1 }
 0xdc3   :  { %2536 = vsyncpa [#allocation5], 1 }
 0xdc4   :  { %2538 = vsyncpa [#allocation5 + $0x1], 1 }

</bundles_post_ra>
